<compile_context>
chip_gen: v6e
topology: v6e:2x2x1
jax: 0.10.0
libtpu: 0.0.40
codegen_flags: <defaults>
</compile_context>

<pallas_src>
import jax
import jax.numpy as jnp
from jax.experimental import pallas as pl
from jax.experimental.pallas import tpu as pltpu


def _round_up(x, m):
    return (x + m - 1) // m * m


def _make_kernel(wp, m2):
    """Kernel closure over the static tap offsets (wp = W+2, m2 = rows/block)."""
    offs = tuple(kh * wp + kw for kh in range(3) for kw in range(3))

    def kernel(x_ref, w_ref, b_ref, a_ref, o_ref):
        # x_ref: (1, S_in, Cin)  padded-row slab for this (batch, row-block)
        # w_ref: (9, Cin, TCO)   per-tap weights for this Cout block
        # b_ref: (1, TCO)        bias (f32)
        # a_ref: (1, TCO)        PReLU alpha (f32, per channel)
        # o_ref: (1, M2, TCO)
        acc = jnp.dot(x_ref[0, offs[0]:offs[0] + m2, :], w_ref[0],
                      preferred_element_type=jnp.float32)
        for t in range(1, 9):                       # unrolled: static offsets
            o = offs[t]
            acc = acc + jnp.dot(x_ref[0, o:o + m2, :], w_ref[t],
                                preferred_element_type=jnp.float32)
        acc = acc + b_ref[...]                      # (1,TCO) broadcasts over rows
        acc = jnp.where(acc > 0, acc, a_ref[...] * acc)   # PReLU
        o_ref[0] = acc.astype(o_ref.dtype)

    return kernel


def conv_block_pallas(x_nchw, weight_oihw, bias, alpha,
                      rows_per_tile=None, compute_dtype=None):
    """ConvBlock forward: Conv2d(k=3, s=1, p=1, bias=True) + PReLU.

    x_nchw:      (N, Cin, H, W)
    weight_oihw: (Cout, Cin, 3, 3)   (PyTorch layout)
    bias:        (Cout,)
    alpha:       PReLU parameter, scalar or (Cout,)
    returns:     (N, Cout, H, W)
    """
    N, Cin, H, W = x_nchw.shape
    Cout = weight_oihw.shape[0]
    cdtype = jnp.dtype(compute_dtype) if compute_dtype is not None else jnp.dtype(x_nchw.dtype)
    out_dtype = x_nchw.dtype

    LANES = 128
    Cp = _round_up(Cout, LANES)
    TCO = 256 if Cp % 256 == 0 else 128            # 256-wide MXU on v6e/v7x
    CB = Cp // TCO

    Wp = W + 2
    # ~512 matmul rows per block: near HBM roofline, small enough for v7x VMEM.
    if rows_per_tile is None:
        rows_per_tile = max(1, 512 // Wp)
    TH = max(1, min(H, rows_per_tile))              # output rows per block
    MB = -(-H // TH)                                # row blocks per image
    H_blk = MB * TH

    M2 = TH * Wp                                    # matmul rows per block
    S_in = (TH + 2) * Wp + 8                        # slab rows (2-row halo + slack)

    # ---- layout glue (plain JAX): NHWC, zero pad, per-row-block slabs ----
    # TODO(synk): for layer stacks keep activations NHWC end-to-end to drop the
    # NCHW<->NHWC transposes (kept here to match the PyTorch interface).
    x_nhwc = jnp.transpose(x_nchw, (0, 2, 3, 1)).astype(cdtype)     # (N,H,W,Cin)
    x_pad = jnp.pad(x_nhwc, ((0, 0), (1, H_blk - H + 2), (1, 1), (0, 0)))
    x_flat = x_pad.reshape(N, (H_blk + 3) * Wp, Cin)
    need = (MB - 1) * TH * Wp + S_in
    if need > x_flat.shape[1]:
        x_flat = jnp.pad(x_flat, ((0, 0), (0, need - x_flat.shape[1]), (0, 0)))
    # Per-row-block slabs with halo: ~1x copy of the input (not 9x im2col).
    x_blk = jnp.stack([x_flat[:, m * TH * Wp: m * TH * Wp + S_in, :]
                       for m in range(MB)], axis=1)
    x_blk = x_blk.reshape(N * MB, S_in, Cin)

    # Weights: (Cout, Cin, 3, 3) -> (9, Cin, Cp), tap-major leading dim.
    w = jnp.transpose(weight_oihw, (2, 3, 1, 0)).reshape(9, Cin, Cout)
    w = jnp.pad(w, ((0, 0), (0, 0), (0, Cp - Cout))).astype(cdtype)

    b = jnp.pad(jnp.asarray(bias, jnp.float32).reshape(1, Cout),
                ((0, 0), (0, Cp - Cout)))
    a = jnp.broadcast_to(jnp.asarray(alpha, jnp.float32).reshape(-1), (Cout,))
    a = jnp.pad(a.reshape(1, Cout), ((0, 0), (0, Cp - Cout)))

    kernel = _make_kernel(Wp, M2)

    c_bytes = cdtype.itemsize
    o_bytes = jnp.dtype(out_dtype).itemsize
    flops = 2 * (N * MB) * M2 * (9 * Cin) * Cp
    bytes_accessed = (x_blk.size * c_bytes + w.size * c_bytes
                      + (b.size + a.size) * 4 + (N * MB) * M2 * Cp * o_bytes)
    # Double-buffered per-block footprint + f32 accumulator + headroom.
    vmem_est = (2 * (S_in * Cin * c_bytes + 9 * Cin * TCO * c_bytes
                     + M2 * TCO * o_bytes + 2 * TCO * 4)
                + M2 * TCO * 4 + (4 << 20))
    vmem_limit = int(min(max(vmem_est, 32 << 20), 64 << 20))

    out = pl.pallas_call(
        kernel,
        out_shape=jax.ShapeDtypeStruct((N * MB, M2, Cp), out_dtype),
        grid_spec=pltpu.PrefetchScalarGridSpec(
            num_scalar_prefetch=0,
            grid=(N * MB, CB),                      # Cout axis innermost:
            in_specs=[                              # x block stays VMEM-resident
                pl.BlockSpec((1, S_in, Cin), lambda mb, co: (mb, 0, 0)),
                pl.BlockSpec((9, Cin, TCO), lambda mb, co: (0, 0, co)),
                pl.BlockSpec((1, TCO), lambda mb, co: (0, co)),
                pl.BlockSpec((1, TCO), lambda mb, co: (0, co)),
            ],
            out_specs=pl.BlockSpec((1, M2, TCO), lambda mb, co: (mb, 0, co)),
        ),
        compiler_params=pltpu.CompilerParams(
            dimension_semantics=("parallel", "arbitrary"),
            vmem_limit_bytes=vmem_limit),
        cost_estimate=pl.CostEstimate(flops=int(flops), transcendentals=0,
                                      bytes_accessed=int(bytes_accessed)),
    )(x_blk, w, b, a)

    # (N*MB, TH*Wp, Cp) -> (N, H_blk, Wp, Cp) is a pure metadata reshape; the
    # junk pad columns/rows/channels are sliced off and the slice fuses with
    # the final NCHW transpose (one output pass, needed for the torch layout).
    out = out.reshape(N, H_blk, Wp, Cp)[:, :H, :W, :Cout]
    return jnp.transpose(out, (0, 3, 1, 2)).astype(out_dtype)


def conv_block_reference(x_nchw, weight_oihw, bias, alpha):
    """Pure-JAX reference (matches PyTorch Conv2d(pad=1) + PReLU)."""
    out = jax.lax.conv_general_dilated(
        x_nchw, weight_oihw,
        window_strides=(1, 1), padding=((1, 1), (1, 1)),
        dimension_numbers=("NCHW", "OIHW", "NCHW"))
    out = out + bias.reshape(1, -1, 1, 1)
    alpha = jnp.asarray(alpha, out.dtype)
    return jnp.where(out > 0, out, alpha * out)


if __name__ == "__main__":
    key = jax.random.PRNGKey(0)
    N, Cin, Cout, H, W = 2, 4, 8, 16, 16
    k_x, k_w, k_b = jax.random.split(key, 3)

    # Round test data to bf16 resolution so the comparison is insensitive to
    # whichever f32/bf16-pass matmul path the MXU uses on either side.
    x = jax.random.normal(k_x, (N, Cin, H, W), jnp.float32)
    x = x.astype(jnp.bfloat16).astype(jnp.float32)

    # Deterministic parameter init (shapes as in torch.nn.Conv2d / PReLU).
    fan_in = Cin * 3 * 3
    bound = 1.0 / (fan_in ** 0.5)
    weight = jax.random.uniform(k_w, (Cout, Cin, 3, 3), jnp.float32,
                                minval=-bound, maxval=bound)
    weight = weight.astype(jnp.bfloat16).astype(jnp.float32)
    bias = jax.random.uniform(k_b, (Cout,), jnp.float32,
                              minval=-bound, maxval=bound)
    alpha = jnp.float32(0.25)           # torch.nn.PReLU() default init

    out = conv_block_pallas(x, weight, bias, alpha)
    jax.block_until_ready(out)

    ref = conv_block_reference(x, weight, bias, alpha)
    assert out.shape == (N, Cout, H, W)
    assert jnp.allclose(out, ref, atol=1e-4, rtol=1e-4), float(
        jnp.max(jnp.abs(out - ref)))

    print("KERNEL_OK")
</pallas_src>

<mosaic_0001>
module attributes {stable_mosaic.version = 11 : i64} {
  func.func @kernel(%arg0: i32, %arg1: i32, %arg2: memref<1x332x4xf32, #tpu.memory_space<vmem>>, %arg3: memref<9x4x128xf32, #tpu.memory_space<vmem>>, %arg4: memref<1x128xf32, #tpu.memory_space<vmem>>, %arg5: memref<1x128xf32, #tpu.memory_space<vmem>>, %arg6: memref<1x288x128xf32, #tpu.memory_space<vmem>>) attributes {dimension_semantics = [#tpu.dimension_semantics<parallel>, #tpu.dimension_semantics<arbitrary>], iteration_bounds = array<i64: 2, 1>, scalar_prefetch = 0 : i64, scratch_operands = 0 : i64, tpu.core_type = #tpu.core_type<tc>, window_params = [{transform_indices = @transform_0, window_bounds = array<i64: 1, 332, 4>}, {transform_indices = @transform_1, window_bounds = array<i64: 9, 4, 128>}, {transform_indices = @transform_2, window_bounds = array<i64: 1, 128>}, {transform_indices = @transform_3, window_bounds = array<i64: 1, 128>}, {transform_indices = @transform_4, window_bounds = array<i64: 1, 288, 128>}]} {
    %c0 = arith.constant 0 : index
    %c0_0 = arith.constant 0 : index
    %c0_1 = arith.constant 0 : index
    %0 = vector.load %arg2[%c0, %c0_0, %c0_1] : memref<1x332x4xf32, #tpu.memory_space<vmem>>, vector<1x288x4xf32>
    %1 = vector.shape_cast %0 : vector<1x288x4xf32> to vector<288x4xf32>
    %c0_2 = arith.constant 0 : index
    %c0_3 = arith.constant 0 : index
    %c0_4 = arith.constant 0 : index
    %2 = vector.load %arg3[%c0_2, %c0_3, %c0_4] : memref<9x4x128xf32, #tpu.memory_space<vmem>>, vector<1x4x128xf32>
    %3 = vector.shape_cast %2 : vector<1x4x128xf32> to vector<4x128xf32>
    %cst = arith.constant dense<0.000000e+00> : vector<288x128xf32>
    %4 = tpu.matmul %1, %3, %cst {dimension_numbers = #tpu.dot_dimension_numbers<[1], [0], [0], [1], [0, 0, 1, 1], [], []>} : vector<288x4xf32>, vector<4x128xf32>, vector<288x128xf32> -> vector<288x128xf32>
    %c0_5 = arith.constant 0 : index
    %c1 = arith.constant 1 : index
    %c0_6 = arith.constant 0 : index
    %5 = vector.load %arg2[%c0_5, %c1, %c0_6] : memref<1x332x4xf32, #tpu.memory_space<vmem>>, vector<1x288x4xf32>
    %6 = vector.shape_cast %5 : vector<1x288x4xf32> to vector<288x4xf32>
    %c1_7 = arith.constant 1 : index
    %c0_8 = arith.constant 0 : index
    %c0_9 = arith.constant 0 : index
    %7 = vector.load %arg3[%c1_7, %c0_8, %c0_9] : memref<9x4x128xf32, #tpu.memory_space<vmem>>, vector<1x4x128xf32>
    %8 = vector.shape_cast %7 : vector<1x4x128xf32> to vector<4x128xf32>
    %cst_10 = arith.constant dense<0.000000e+00> : vector<288x128xf32>
    %9 = tpu.matmul %6, %8, %cst_10 {dimension_numbers = #tpu.dot_dimension_numbers<[1], [0], [0], [1], [0, 0, 1, 1], [], []>} : vector<288x4xf32>, vector<4x128xf32>, vector<288x128xf32> -> vector<288x128xf32>
    %10 = arith.addf %4, %9 : vector<288x128xf32>
    %c0_11 = arith.constant 0 : index
    %c2 = arith.constant 2 : index
    %c0_12 = arith.constant 0 : index
    %11 = vector.load %arg2[%c0_11, %c2, %c0_12] : memref<1x332x4xf32, #tpu.memory_space<vmem>>, vector<1x288x4xf32>
    %12 = vector.shape_cast %11 : vector<1x288x4xf32> to vector<288x4xf32>
    %c2_13 = arith.constant 2 : index
    %c0_14 = arith.constant 0 : index
    %c0_15 = arith.constant 0 : index
    %13 = vector.load %arg3[%c2_13, %c0_14, %c0_15] : memref<9x4x128xf32, #tpu.memory_space<vmem>>, vector<1x4x128xf32>
    %14 = vector.shape_cast %13 : vector<1x4x128xf32> to vector<4x128xf32>
    %cst_16 = arith.constant dense<0.000000e+00> : vector<288x128xf32>
    %15 = tpu.matmul %12, %14, %cst_16 {dimension_numbers = #tpu.dot_dimension_numbers<[1], [0], [0], [1], [0, 0, 1, 1], [], []>} : vector<288x4xf32>, vector<4x128xf32>, vector<288x128xf32> -> vector<288x128xf32>
    %16 = arith.addf %10, %15 : vector<288x128xf32>
    %c0_17 = arith.constant 0 : index
    %c18 = arith.constant 18 : index
    %c0_18 = arith.constant 0 : index
    %17 = vector.load %arg2[%c0_17, %c18, %c0_18] : memref<1x332x4xf32, #tpu.memory_space<vmem>>, vector<1x288x4xf32>
    %18 = vector.shape_cast %17 : vector<1x288x4xf32> to vector<288x4xf32>
    %c3 = arith.constant 3 : index
    %c0_19 = arith.constant 0 : index
    %c0_20 = arith.constant 0 : index
    %19 = vector.load %arg3[%c3, %c0_19, %c0_20] : memref<9x4x128xf32, #tpu.memory_space<vmem>>, vector<1x4x128xf32>
    %20 = vector.shape_cast %19 : vector<1x4x128xf32> to vector<4x128xf32>
    %cst_21 = arith.constant dense<0.000000e+00> : vector<288x128xf32>
    %21 = tpu.matmul %18, %20, %cst_21 {dimension_numbers = #tpu.dot_dimension_numbers<[1], [0], [0], [1], [0, 0, 1, 1], [], []>} : vector<288x4xf32>, vector<4x128xf32>, vector<288x128xf32> -> vector<288x128xf32>
    %22 = arith.addf %16, %21 : vector<288x128xf32>
    %c0_22 = arith.constant 0 : index
    %c19 = arith.constant 19 : index
    %c0_23 = arith.constant 0 : index
    %23 = vector.load %arg2[%c0_22, %c19, %c0_23] : memref<1x332x4xf32, #tpu.memory_space<vmem>>, vector<1x288x4xf32>
    %24 = vector.shape_cast %23 : vector<1x288x4xf32> to vector<288x4xf32>
    %c4 = arith.constant 4 : index
    %c0_24 = arith.constant 0 : index
    %c0_25 = arith.constant 0 : index
    %25 = vector.load %arg3[%c4, %c0_24, %c0_25] : memref<9x4x128xf32, #tpu.memory_space<vmem>>, vector<1x4x128xf32>
    %26 = vector.shape_cast %25 : vector<1x4x128xf32> to vector<4x128xf32>
    %cst_26 = arith.constant dense<0.000000e+00> : vector<288x128xf32>
    %27 = tpu.matmul %24, %26, %cst_26 {dimension_numbers = #tpu.dot_dimension_numbers<[1], [0], [0], [1], [0, 0, 1, 1], [], []>} : vector<288x4xf32>, vector<4x128xf32>, vector<288x128xf32> -> vector<288x128xf32>
    %28 = arith.addf %22, %27 : vector<288x128xf32>
    %c0_27 = arith.constant 0 : index
    %c20 = arith.constant 20 : index
    %c0_28 = arith.constant 0 : index
    %29 = vector.load %arg2[%c0_27, %c20, %c0_28] : memref<1x332x4xf32, #tpu.memory_space<vmem>>, vector<1x288x4xf32>
    %30 = vector.shape_cast %29 : vector<1x288x4xf32> to vector<288x4xf32>
    %c5 = arith.constant 5 : index
    %c0_29 = arith.constant 0 : index
    %c0_30 = arith.constant 0 : index
    %31 = vector.load %arg3[%c5, %c0_29, %c0_30] : memref<9x4x128xf32, #tpu.memory_space<vmem>>, vector<1x4x128xf32>
    %32 = vector.shape_cast %31 : vector<1x4x128xf32> to vector<4x128xf32>
    %cst_31 = arith.constant dense<0.000000e+00> : vector<288x128xf32>
    %33 = tpu.matmul %30, %32, %cst_31 {dimension_numbers = #tpu.dot_dimension_numbers<[1], [0], [0], [1], [0, 0, 1, 1], [], []>} : vector<288x4xf32>, vector<4x128xf32>, vector<288x128xf32> -> vector<288x128xf32>
    %34 = arith.addf %28, %33 : vector<288x128xf32>
    %c0_32 = arith.constant 0 : index
    %c36 = arith.constant 36 : index
    %c0_33 = arith.constant 0 : index
    %35 = vector.load %arg2[%c0_32, %c36, %c0_33] : memref<1x332x4xf32, #tpu.memory_space<vmem>>, vector<1x288x4xf32>
    %36 = vector.shape_cast %35 : vector<1x288x4xf32> to vector<288x4xf32>
    %c6 = arith.constant 6 : index
    %c0_34 = arith.constant 0 : index
    %c0_35 = arith.constant 0 : index
    %37 = vector.load %arg3[%c6, %c0_34, %c0_35] : memref<9x4x128xf32, #tpu.memory_space<vmem>>, vector<1x4x128xf32>
    %38 = vector.shape_cast %37 : vector<1x4x128xf32> to vector<4x128xf32>
    %cst_36 = arith.constant dense<0.000000e+00> : vector<288x128xf32>
    %39 = tpu.matmul %36, %38, %cst_36 {dimension_numbers = #tpu.dot_dimension_numbers<[1], [0], [0], [1], [0, 0, 1, 1], [], []>} : vector<288x4xf32>, vector<4x128xf32>, vector<288x128xf32> -> vector<288x128xf32>
    %40 = arith.addf %34, %39 : vector<288x128xf32>
    %c0_37 = arith.constant 0 : index
    %c37 = arith.constant 37 : index
    %c0_38 = arith.constant 0 : index
    %41 = vector.load %arg2[%c0_37, %c37, %c0_38] : memref<1x332x4xf32, #tpu.memory_space<vmem>>, vector<1x288x4xf32>
    %42 = vector.shape_cast %41 : vector<1x288x4xf32> to vector<288x4xf32>
    %c7 = arith.constant 7 : index
    %c0_39 = arith.constant 0 : index
    %c0_40 = arith.constant 0 : index
    %43 = vector.load %arg3[%c7, %c0_39, %c0_40] : memref<9x4x128xf32, #tpu.memory_space<vmem>>, vector<1x4x128xf32>
    %44 = vector.shape_cast %43 : vector<1x4x128xf32> to vector<4x128xf32>
    %cst_41 = arith.constant dense<0.000000e+00> : vector<288x128xf32>
    %45 = tpu.matmul %42, %44, %cst_41 {dimension_numbers = #tpu.dot_dimension_numbers<[1], [0], [0], [1], [0, 0, 1, 1], [], []>} : vector<288x4xf32>, vector<4x128xf32>, vector<288x128xf32> -> vector<288x128xf32>
    %46 = arith.addf %40, %45 : vector<288x128xf32>
    %c0_42 = arith.constant 0 : index
    %c38 = arith.constant 38 : index
    %c0_43 = arith.constant 0 : index
    %47 = vector.load %arg2[%c0_42, %c38, %c0_43] : memref<1x332x4xf32, #tpu.memory_space<vmem>>, vector<1x288x4xf32>
    %48 = vector.shape_cast %47 : vector<1x288x4xf32> to vector<288x4xf32>
    %c8 = arith.constant 8 : index
    %c0_44 = arith.constant 0 : index
    %c0_45 = arith.constant 0 : index
    %49 = vector.load %arg3[%c8, %c0_44, %c0_45] : memref<9x4x128xf32, #tpu.memory_space<vmem>>, vector<1x4x128xf32>
    %50 = vector.shape_cast %49 : vector<1x4x128xf32> to vector<4x128xf32>
    %cst_46 = arith.constant dense<0.000000e+00> : vector<288x128xf32>
    %51 = tpu.matmul %48, %50, %cst_46 {dimension_numbers = #tpu.dot_dimension_numbers<[1], [0], [0], [1], [0, 0, 1, 1], [], []>} : vector<288x4xf32>, vector<4x128xf32>, vector<288x128xf32> -> vector<288x128xf32>
    %52 = arith.addf %46, %51 : vector<288x128xf32>
    %c0_47 = arith.constant 0 : index
    %c0_48 = arith.constant 0 : index
    %53 = vector.load %arg4[%c0_47, %c0_48] : memref<1x128xf32, #tpu.memory_space<vmem>>, vector<1x128xf32>
    %54 = vector.broadcast %53 : vector<1x128xf32> to vector<288x128xf32>
    %55 = arith.addf %52, %54 : vector<288x128xf32>
    %cst_49 = arith.constant 0.000000e+00 : f32
    %56 = vector.broadcast %cst_49 : f32 to vector<288x128xf32>
    %57 = arith.cmpf ogt, %55, %56 : vector<288x128xf32>
    %c0_50 = arith.constant 0 : index
    %c0_51 = arith.constant 0 : index
    %58 = vector.load %arg5[%c0_50, %c0_51] : memref<1x128xf32, #tpu.memory_space<vmem>>, vector<1x128xf32>
    %59 = vector.broadcast %58 : vector<1x128xf32> to vector<288x128xf32>
    %60 = arith.mulf %59, %55 : vector<288x128xf32>
    %61 = arith.select %57, %55, %60 : vector<288x128xi1>, vector<288x128xf32>
    %c0_52 = arith.constant 0 : index
    %c0_53 = arith.constant 0 : index
    %c0_54 = arith.constant 0 : index
    %62 = vector.load %arg6[%c0_52, %c0_53, %c0_54] : memref<1x288x128xf32, #tpu.memory_space<vmem>>, vector<1x288x128xf32>
    %63 = vector.shape_cast %62 : vector<1x288x128xf32> to vector<288x128xf32>
    %64 = vector.shape_cast %61 : vector<288x128xf32> to vector<1x288x128xf32>
    tpu.vector_store %arg6[%c0_52, %c0_53, %c0_54], %64 {strides = array<i32>} : memref<1x288x128xf32, #tpu.memory_space<vmem>>, vector<1x288x128xf32>,
    return
  }
  func.func @transform_0(%arg0: i32, %arg1: i32) -> (i32, i32, i32) {
    %c0_i32 = arith.constant 0 : i32
    %c0_i32_0 = arith.constant 0 : i32
    %c0_i32_1 = arith.constant 0 : i32
    return %arg0, %c0_i32, %c0_i32_0 : i32, i32, i32
  }
  func.func @transform_1(%arg0: i32, %arg1: i32) -> (i32, i32, i32) {
    %c0_i32 = arith.constant 0 : i32
    %c0_i32_0 = arith.constant 0 : i32
    %c0_i32_1 = arith.constant 0 : i32
    return %c0_i32, %c0_i32_0, %arg1 : i32, i32, i32
  }
  func.func @transform_2(%arg0: i32, %arg1: i32) -> (i32, i32) {
    %c0_i32 = arith.constant 0 : i32
    %c0_i32_0 = arith.constant 0 : i32
    return %c0_i32, %arg1 : i32, i32
  }
  func.func @transform_3(%arg0: i32, %arg1: i32) -> (i32, i32) {
    %c0_i32 = arith.constant 0 : i32
    %c0_i32_0 = arith.constant 0 : i32
    return %c0_i32, %arg1 : i32, i32
  }
  func.func @transform_4(%arg0: i32, %arg1: i32) -> (i32, i32, i32) {
    %c0_i32 = arith.constant 0 : i32
    %c0_i32_0 = arith.constant 0 : i32
    return %arg0, %c0_i32, %arg1 : i32, i32, i32
  }
}

</mosaic_0001>

<bundles_post_ra>
// kernel: tpu_custom_call.1
= control target key start
LH: loop header
LB: loop body
LE: loop exit
PB: predicated region body
PF: predicated region fallthrough
CT: control target
= control target key end

     0   :  { %9 = vsyncpa [#allocation3], 0  ;;  %s7194_s0 = inlined_call_operand.vmem [shape: f32[2,332,4], index: 0, kind: input, shape index: {}]   ;;  %s7195_s1 = inlined_call_operand.vmem [shape: f32[9,4,128], index: 1, kind: input, shape index: {}]   ;;  %s7196_s2 = inlined_call_operand.vmem [shape: f32[1,128], index: 2, kind: input, shape index: {}]   ;;  %s7197_s3 = inlined_call_operand.vmem [shape: f32[1,128], index: 3, kind: input, shape index: {}]   ;;  %s7198_s4 = inlined_call_operand.hbm [shape: f32[2,288,128], index: 4, kind: output, shape index: {}]  }
   0x1   :  { %11 = vsyncpa [#allocation3 + $0x1], 0  ;;  %s5734_s15 = smov 0   ;;  %s5736_s16 = smov 0  }
   0x2   :  { %s5738_s17 = smov 0   ;;  %s5740_s18 = smov 0  }
   0x3   :  { %s5742_s19 = smov 0   ;;  %s5744_s20 = smov 0  }
   0x4 LB: > { %s4374_s21 = sadd.s32 4294967295, %s5704_s20   ;;  %s4375_s22 = sadd.s32 4294967294, %s5704_s20   ;;  %s5704_s20 = sphi %s5744_s20, %s17_s20   ;;  %s5700_s19 = sphi %s5742_s19, %s7205_s19   ;;  %s5696_s18 = sphi %s5740_s18, %s7204_s18   ;;  %s5692_s17 = sphi %s5738_s17, %s7203_s17   ;;  %s5688_s16 = sphi %s5736_s16, %s7202_s16   ;;  %s5684_s15 = sphi %s5734_s15, %s7201_s15  }
   0x5   : > { %s29_s23 = sadd.s32 1, %s5700_s19  ;;  %s142_s24 = sadd.s32 1, %s5692_s17 }
   0x6   : > { %p31_p0 = scmp.ge.s32.totalorder %s29_s23, 2  ;;  %p152_p1 = scmp.ne.s32.totalorder %s5692_s17, %s5688_s16 }
   0x7   : > { %p153_p2 = scmp.eq.s32.totalorder %s4374_s21, 1  ;;  %p158_p3 = scmp.ne.s32.totalorder %s5688_s16, %s5684_s15 }
   0x8   : > { %s7207_s23 = smov (%p31_p0, %s29_s23), 0  ;;  %p159_p5 = scmp.eq.s32.totalorder %s4375_s22, 1 }
   0x9   : > { %p5774_p4 = por %p153_p2, %p152_p1  ;;  %s137_s26 = ssub.s32 %s5700_s19, %s7207_s23 }
   0xa   : > { %p4381_p6 = scmp.ge.s32.totalorder %s5704_s20, 1  ;;  %p140_p7 = scmp.eq.s32.totalorder %s137_s26, 0 }
   0xb   : > { %p5781_p8 = por %p159_p5, %p158_p3  ;;  %p204_p9 = scmp.lt.s32.totalorder %s5704_s20, 3 }
   0xc   : > { %s5787_s28 = scalar_select %p140_p7, %s5692_s17, %s142_s24  }
   0xd   : > { %p205_p10 = pnand %p4381_p6, %p204_p9 }
   0xe   : > { %p240_p11 = scmp.lt.s32.totalorder (!%p205_p10), %s5696_s18, 1  ;;  %s5570_s24 = smul.u32 (!%p205_p10), 4608, %s5696_s18 }
   0xf   : > { %208 = sbr.rel (%p205_p10) target bundleno = 565 (0x235), region = 36  ;;  %s5706_s7 = smov (!%p205_p10), [#allocation2]  }
  0x10   : > { %s7141_s30 = scalar_lea.hbm (!%p205_p10), %s7198_s4, %s5570_s24  ;;  %s5632_s8 = sshll.u32 (!%p205_p10), %s5706_s7, 4  ;;  %s5633_s8 = int_to_ptr.vmem [resolvable:$false] %s5632_s8 }
  0x14   : > { %v4383_v0 = vld [vmem:[%s7195_s1 + $0x4] sm:$0xf]  ;;  %vm439_vm0 = vcmask 1043456   ;;  %v291_v1 = vld [vmem:[%s7195_s1] sm:$0xf]  ;;  %s241_s9 = scalar_select %p240_p11, %s5696_s18, 1 }
  0x15   : > { %5566 = vmatprep.subr.msk.mxu1 %vm439_vm0, %v4383_v0  ;;  %5062 = vmatprep.subr.msk.mxu0 %vm439_vm0, %v4383_v0  ;;  %v4458_v2 = vld [vmem:[%s7195_s1 + $0x8] sm:$0xf]  ;;  %vm330_vm1 = vcmask 31744   ;;  %v5824_v9 = vld [vmem:[%s7195_s1 + $0xc] sm:$0xf] }
  0x16   : > { %5567 = vmatpush3.msk.msra.mxu1 %vm439_vm0, %v4383_v0  ;;  %5063 = vmatpush3.msk.msra.mxu0 %vm439_vm0, %v4383_v0  ;;  %s5569_s10 = smul.u32 336, %s241_s9  ;;  %v5829_v10 = vld [vmem:[%s7195_s1 + $0x10] sm:$0xf]  ;;  %v5914_v47 = vld [vmem:[%s7195_s1 + $0x14] sm:$0xf]  ;;  %s5634_s9 = scalar_lea.vmem %s5633_s8, 9216 }
  0x17   : > { %5118 = vmatprep.subr.msk.mxu1 %vm439_vm0, %v291_v1  ;;  %5174 = vmatprep.subr.msk.mxu0 %vm439_vm0, %v4458_v2  ;;  %v5919_v48 = vld [vmem:[%s7195_s1 + $0x18] sm:$0xf] }
  0x18   : > { %s5809_s13 = scalar_lea.vmem %s7194_s0, %s5569_s10  ;;  %s237_s10 = sand.u32 1, %s5688_s16  }
  0x19   : > { %v292_v3 = vld [vmem:[%s5809_s13 + $0x1] sm:$0xff]  ;;  %v310_v4 = vld [vmem:[%s5809_s13 + $0x91] sm:$0xff]  ;;  %v293_v5 = vld [vmem:[%s5809_s13 + $0x9] sm:$0xff]  ;;  %s7149_s5 = scalar_lea.sflag [#allocation3], %s237_s10 }
  0x1a   : > { %5064 = vmatprep.mubr.msk.f32.mxu0 %vm330_vm1, %v292_v3  ;;  %5091 = vmatprep.mubr.msk.f32.mxu1 %vm330_vm1, %v310_v4  ;;  %v311_v6 = vld [vmem:[%s5809_s13 + $0x99] sm:$0xff]  ;;  %v294_v7 = vld [vmem:[%s5809_s13 + $0x11] sm:$0xff]  ;;  %v312_v8 = vld [vmem:[%s5809_s13 + $0xa1] sm:$0xff] }
  0x1b   : > { %5065 = vmatmul.mubr.msk.f32.vlgmr.msra.gmra.mxu0 %vm330_vm1, %v293_v5  ;;  %5092 = vmatmul.mubr.msk.f32.vlgmr.msra.gmra.mxu1 %vm330_vm1, %v311_v6  ;;  %v295_v11 = vld [vmem:[%s5809_s13 + $0x19] sm:$0xff]  ;;  %v313_v12 = vld [vmem:[%s5809_s13 + $0xa9] sm:$0xff]  ;;  %v296_v13 = vld [vmem:[%s5809_s13 + $0x21] sm:$0xff] }
  0x1c   : > { %5119 = vmatpush3.msk.msra.mxu1 %vm439_vm0, %v291_v1  ;;  %5175 = vmatpush3.msk.msra.mxu0 %vm439_vm0, %v4458_v2  ;;  %v314_v14 = vld [vmem:[%s5809_s13 + $0xb1] sm:$0xff]  ;;  %v297_v15 = vld [vmem:[%s5809_s13 + $0x29] sm:$0xff]  ;;  %v315_v16 = vld [vmem:[%s5809_s13 + $0xb9] sm:$0xff] }
  0x1d   : > { %5067 = vmatprep.mubr.msk.f32.mxu0 %vm330_vm1, %v294_v7  ;;  %5094 = vmatprep.mubr.msk.f32.mxu1 %vm330_vm1, %v312_v8  ;;  %v298_v17 = vld [vmem:[%s5809_s13 + $0x31] sm:$0xff]  ;;  %v316_v18 = vld [vmem:[%s5809_s13 + $0xc1] sm:$0xff]  ;;  %v299_v19 = vld [vmem:[%s5809_s13 + $0x39] sm:$0xff] }
  0x1e   : > { %5230 = vmatprep.subr.msk.mxu1 %vm439_vm0, %v5824_v9  ;;  %5286 = vmatprep.subr.msk.mxu0 %vm439_vm0, %v5829_v10  ;;  %v317_v20 = vld [vmem:[%s5809_s13 + $0xc9] sm:$0xff]  ;;  %v300_v21 = vld [vmem:[%s5809_s13 + $0x41] sm:$0xff]  ;;  %v318_v22 = vld [vmem:[%s5809_s13 + $0xd1] sm:$0xff] }
  0x1f   : > { %5068 = vmatmul.mubr.msk.f32.gmra.mxu0 %vm330_vm1, %v295_v11  ;;  %5095 = vmatmul.mubr.msk.f32.gmra.mxu1 %vm330_vm1, %v313_v12  ;;  %v301_v23 = vld [vmem:[%s5809_s13 + $0x49] sm:$0xff]  ;;  %v319_v24 = vld [vmem:[%s5809_s13 + $0xd9] sm:$0xff]  ;;  %v302_v25 = vld [vmem:[%s5809_s13 + $0x51] sm:$0xff] }
  0x20   : > { %5070 = vmatprep.mubr.msk.f32.mxu0 %vm330_vm1, %v296_v13  ;;  %5097 = vmatprep.mubr.msk.f32.mxu1 %vm330_vm1, %v314_v14  ;;  %v320_v26 = vld [vmem:[%s5809_s13 + $0xe1] sm:$0xff]  ;;  %v303_v27 = vld [vmem:[%s5809_s13 + $0x59] sm:$0xff]  ;;  %v321_v28 = vld [vmem:[%s5809_s13 + $0xe9] sm:$0xff] }
  0x21   : > { %v304_v29 = vld [vmem:[%s5809_s13 + $0x61] sm:$0xff]  ;;  %v322_v30 = vld [vmem:[%s5809_s13 + $0xf1] sm:$0xff]  ;;  %v305_v31 = vld [vmem:[%s5809_s13 + $0x69] sm:$0xff] }
  0x22   : > { %v323_v32 = vld [vmem:[%s5809_s13 + $0xf9] sm:$0xff]  ;;  %v306_v33 = vld [vmem:[%s5809_s13 + $0x71] sm:$0xff]  ;;  %v324_v34 = vld [vmem:[%s5809_s13 + $0x101] sm:$0xff] }
  0x23   : > { %5071 = vmatmul.mubr.msk.f32.gmra.mxu0 %vm330_vm1, %v297_v15  ;;  %5098 = vmatmul.mubr.msk.f32.gmra.mxu1 %vm330_vm1, %v315_v16  ;;  %v307_v35 = vld [vmem:[%s5809_s13 + $0x79] sm:$0xff]  ;;  %v325_v36 = vld [vmem:[%s5809_s13 + $0x109] sm:$0xff]  ;;  %v308_v37 = vld [vmem:[%s5809_s13 + $0x81] sm:$0xff] }
  0x24   : > { %5073 = vmatprep.mubr.msk.f32.mxu0 %vm330_vm1, %v298_v17  ;;  %5100 = vmatprep.mubr.msk.f32.mxu1 %vm330_vm1, %v316_v18  ;;  %v326_v38 = vld [vmem:[%s5809_s13 + $0x111] sm:$0xff]  ;;  %v309_v39 = vld [vmem:[%s5809_s13 + $0x89] sm:$0xff]  ;;  %v327_v40 = vld [vmem:[%s5809_s13 + $0x119] sm:$0xff] }
  0x25   : > { %v255_v41 = vld [vmem:[%s5809_s13] sm:$0xff]  ;;  %v256_v43 = vld [vmem:[%s5809_s13 + $0x8] sm:$0xff]  ;;  %v257_v45 = vld [vmem:[%s5809_s13 + $0x10] sm:$0xff] }
  0x26   : > { %v1044_v42 = vld [vmem:[%s5809_s13 + $0x2] sm:$0xff]  ;;  %v1045_v44 = vld [vmem:[%s5809_s13 + $0xa] sm:$0xff]  ;;  %v5907_v46 = vld [vmem:[%s5809_s13 + $0x12] sm:$0xff] }
  0x27   : > { %5074 = vmatmul.mubr.msk.f32.gmra.mxu0 %vm330_vm1, %v299_v19  ;;  %5101 = vmatmul.mubr.msk.f32.gmra.mxu1 %vm330_vm1, %v317_v20  ;;  %v258_v49 = vld [vmem:[%s5809_s13 + $0x18] sm:$0xff]  ;;  %v259_v51 = vld [vmem:[%s5809_s13 + $0x20] sm:$0xff]  ;;  %v260_v53 = vld [vmem:[%s5809_s13 + $0x28] sm:$0xff] }
  0x28   : > { %5076 = vmatprep.mubr.msk.f32.mxu0 %vm330_vm1, %v300_v21  ;;  %5103 = vmatprep.mubr.msk.f32.mxu1 %vm330_vm1, %v318_v22  ;;  %v5927_v50 = vld [vmem:[%s5809_s13 + $0x1a] sm:$0xff]  ;;  %v5934_v52 = vld [vmem:[%s5809_s13 + $0x22] sm:$0xff]  ;;  %v5948_v54 = vld [vmem:[%s5809_s13 + $0x2a] sm:$0xff] }
  0x29   : > { %v261_v55 = vld [vmem:[%s5809_s13 + $0x30] sm:$0xff]  ;;  %v262_v57 = vld [vmem:[%s5809_s13 + $0x38] sm:$0xff]  ;;  %v263_v59 = vld [vmem:[%s5809_s13 + $0x40] sm:$0xff] }
  0x2a   : > { %v5952_v56 = vld [vmem:[%s5809_s13 + $0x32] sm:$0xff]  ;;  %v5962_v58 = vld [vmem:[%s5809_s13 + $0x3a] sm:$0xff]  ;;  %v5966_v60 = vld [vmem:[%s5809_s13 + $0x42] sm:$0xff] }
  0x2b   : > { %5077 = vmatmul.mubr.msk.f32.gmra.mxu0 %vm330_vm1, %v301_v23  ;;  %5104 = vmatmul.mubr.msk.f32.gmra.mxu1 %vm330_vm1, %v319_v24  ;;  %v264_v61 = vld [vmem:[%s5809_s13 + $0x48] sm:$0xff]  ;;  %v265_v63 = vld [vmem:[%s5809_s13 + $0x50] sm:$0xff]  ;;  %v266_v1 = vld [vmem:[%s5809_s13 + $0x58] sm:$0xff] }
  0x2c   : > { %5079 = vmatprep.mubr.msk.f32.mxu0 %vm330_vm1, %v302_v25  ;;  %5106 = vmatprep.mubr.msk.f32.mxu1 %vm330_vm1, %v320_v26  ;;  %v5976_v62 = vld [vmem:[%s5809_s13 + $0x4a] sm:$0xff]  ;;  %v5980_v0 = vld [vmem:[%s5809_s13 + $0x52] sm:$0xff]  ;;  %v5990_v2 = vld [vmem:[%s5809_s13 + $0x5a] sm:$0xff] }
  0x2d   : > { %v267_v3 = vld [vmem:[%s5809_s13 + $0x60] sm:$0xff]  ;;  %v268_v5 = vld [vmem:[%s5809_s13 + $0x68] sm:$0xff]  ;;  %v269_v7 = vld [vmem:[%s5809_s13 + $0x70] sm:$0xff] }
  0x2e   : > { %v5994_v4 = vld [vmem:[%s5809_s13 + $0x62] sm:$0xff]  ;;  %v6004_v6 = vld [vmem:[%s5809_s13 + $0x6a] sm:$0xff]  ;;  %v6008_v8 = vld [vmem:[%s5809_s13 + $0x72] sm:$0xff] }
  0x2f   : > { %5080 = vmatmul.mubr.msk.f32.gmra.mxu0 %vm330_vm1, %v303_v27  ;;  %5107 = vmatmul.mubr.msk.f32.gmra.mxu1 %vm330_vm1, %v321_v28  ;;  %v271_v11 = vld [vmem:[%s5809_s13 + $0x80] sm:$0xff]  ;;  %v272_v13 = vld [vmem:[%s5809_s13 + $0x88] sm:$0xff]  ;;  %v273_v15 = vld [vmem:[%s5809_s13 + $0x90] sm:$0xff] }
  0x30   : > { %5082 = vmatprep.mubr.msk.f32.mxu0 %vm330_vm1, %v304_v29  ;;  %5109 = vmatprep.mubr.msk.f32.mxu1 %vm330_vm1, %v322_v30  ;;  %v6022_v12 = vld [vmem:[%s5809_s13 + $0x82] sm:$0xff]  ;;  %v6032_v14 = vld [vmem:[%s5809_s13 + $0x8a] sm:$0xff]  ;;  %v6036_v16 = vld [vmem:[%s5809_s13 + $0x92] sm:$0xff] }
  0x31   : > { %v274_v17 = vld [vmem:[%s5809_s13 + $0x98] sm:$0xff]  ;;  %v275_v19 = vld [vmem:[%s5809_s13 + $0xa0] sm:$0xff]  ;;  %v276_v21 = vld [vmem:[%s5809_s13 + $0xa8] sm:$0xff] }
  0x32   : > { %v6046_v18 = vld [vmem:[%s5809_s13 + $0x9a] sm:$0xff]  ;;  %v6050_v20 = vld [vmem:[%s5809_s13 + $0xa2] sm:$0xff]  ;;  %v6060_v22 = vld [vmem:[%s5809_s13 + $0xaa] sm:$0xff] }
  0x33   : > { %5083 = vmatmul.mubr.msk.f32.gmra.mxu0 %vm330_vm1, %v305_v31  ;;  %5110 = vmatmul.mubr.msk.f32.gmra.mxu1 %vm330_vm1, %v323_v32  ;;  %v277_v23 = vld [vmem:[%s5809_s13 + $0xb0] sm:$0xff]  ;;  %v278_v25 = vld [vmem:[%s5809_s13 + $0xb8] sm:$0xff]  ;;  %v279_v27 = vld [vmem:[%s5809_s13 + $0xc0] sm:$0xff] }
  0x34   : > { %5085 = vmatprep.mubr.msk.f32.mxu0 %vm330_vm1, %v306_v33  ;;  %5112 = vmatprep.mubr.msk.f32.mxu1 %vm330_vm1, %v324_v34  ;;  %v6064_v24 = vld [vmem:[%s5809_s13 + $0xb2] sm:$0xff]  ;;  %v6074_v26 = vld [vmem:[%s5809_s13 + $0xba] sm:$0xff]  ;;  %v6078_v28 = vld [vmem:[%s5809_s13 + $0xc2] sm:$0xff] }
  0x35   : > { %v280_v29 = vld [vmem:[%s5809_s13 + $0xc8] sm:$0xff]  ;;  %v281_v31 = vld [vmem:[%s5809_s13 + $0xd0] sm:$0xff]  ;;  %v282_v33 = vld [vmem:[%s5809_s13 + $0xd8] sm:$0xff] }
  0x36   : > { %v6088_v30 = vld [vmem:[%s5809_s13 + $0xca] sm:$0xff]  ;;  %v6092_v32 = vld [vmem:[%s5809_s13 + $0xd2] sm:$0xff]  ;;  %v6102_v34 = vld [vmem:[%s5809_s13 + $0xda] sm:$0xff] }
  0x37   : > { %5086 = vmatmul.mubr.msk.f32.gmra.mxu0 %vm330_vm1, %v307_v35  ;;  %5113 = vmatmul.mubr.msk.f32.gmra.mxu1 %vm330_vm1, %v325_v36  ;;  %v283_v35 = vld [vmem:[%s5809_s13 + $0xe0] sm:$0xff] }
  0x38   : > { %5088 = vmatprep.mubr.msk.f32.mxu0 %vm330_vm1, %v308_v37  ;;  %5115 = vmatprep.mubr.msk.f32.mxu1 %vm330_vm1, %v326_v38  ;;  %v6106_v36 = vld [vmem:[%s5809_s13 + $0xe2] sm:$0xff]  ;;  %v6116_v38 = vld [vmem:[%s5809_s13 + $0xea] sm:$0xff] }
  0x39   : > { %v284_v37 = vld [vmem:[%s5809_s13 + $0xe8] sm:$0xff] }
  0x3b   : > { %5089 = vmatmul.mubr.msk.f32.gmra.mxu0 %vm330_vm1, %v309_v39  ;;  %5116 = vmatmul.mubr.msk.f32.gmra.mxu1 %vm330_vm1, %v327_v40  ;;  %v285_v39 = vld [vmem:[%s5809_s13 + $0xf0] sm:$0xff] }
  0x3c   : > { %5120 = vmatprep.mubr.msk.f32.mxu1 %vm330_vm1, %v255_v41  ;;  %5176 = vmatprep.mubr.msk.f32.mxu0 %vm330_vm1, %v1044_v42  ;;  %v6120_v40 = vld [vmem:[%s5809_s13 + $0xf2] sm:$0xff]  ;;  %v6130_v42 = vld [vmem:[%s5809_s13 + $0xfa] sm:$0xff] }
  0x3d   : > { %v286_v41 = vld [vmem:[%s5809_s13 + $0xf8] sm:$0xff] }
  0x3f   : > { %5121 = vmatmul.mubr.msk.f32.vlgmr.msra.gmra.mxu1 %vm330_vm1, %v256_v43  ;;  %5177 = vmatmul.mubr.msk.f32.vlgmr.msra.gmra.mxu0 %vm330_vm1, %v1045_v44  ;;  %v287_v43 = vld [vmem:[%s5809_s13 + $0x100] sm:$0xff] }
  0x40   : > { %5231 = vmatpush3.msk.msra.mxu1 %vm439_vm0, %v5824_v9  ;;  %5287 = vmatpush3.msk.msra.mxu0 %vm439_vm0, %v5829_v10  ;;  %v270_v9 = vld [vmem:[%s5809_s13 + $0x78] sm:$0xff]  ;;  %v6134_v44 = vld [vmem:[%s5809_s13 + $0x102] sm:$0xff] }
  0x41   : > { %5123 = vmatprep.mubr.msk.f32.mxu1 %vm330_vm1, %v257_v45  ;;  %5179 = vmatprep.mubr.msk.f32.mxu0 %vm330_vm1, %v5907_v46  ;;  %v6018_v10 = vld [vmem:[%s5809_s13 + $0x7a] sm:$0xff]  ;;  %v288_v45 = vld [vmem:[%s5809_s13 + $0x108] sm:$0xff] }
  0x42   : > { %5342 = vmatprep.subr.msk.mxu1 %vm439_vm0, %v5914_v47  ;;  %5398 = vmatprep.subr.msk.mxu0 %vm439_vm0, %v5919_v48 }
  0x43   : > { %5124 = vmatmul.mubr.msk.f32.gmra.mxu1 %vm330_vm1, %v258_v49  ;;  %5180 = vmatmul.mubr.msk.f32.gmra.mxu0 %vm330_vm1, %v5927_v50  ;;  %v6144_v49 = vld [vmem:[%s5809_s13 + $0x10a] sm:$0xff] }
  0x44   : > { %5126 = vmatprep.mubr.msk.f32.mxu1 %vm330_vm1, %v259_v51  ;;  %5182 = vmatprep.mubr.msk.f32.mxu0 %vm330_vm1, %v5934_v52  ;;  %v289_v51 = vld [vmem:[%s5809_s13 + $0x110] sm:$0xff] }
  0x47   : > { %5127 = vmatmul.mubr.msk.f32.gmra.mxu1 %vm330_vm1, %v260_v53  ;;  %5183 = vmatmul.mubr.msk.f32.gmra.mxu0 %vm330_vm1, %v5948_v54  ;;  %v6148_v53 = vld [vmem:[%s5809_s13 + $0x112] sm:$0xff] }
  0x48   : > { %5129 = vmatprep.mubr.msk.f32.mxu1 %vm330_vm1, %v261_v55  ;;  %5185 = vmatprep.mubr.msk.f32.mxu0 %vm330_vm1, %v5952_v56  ;;  %v290_v55 = vld [vmem:[%s5809_s13 + $0x118] sm:$0xff] }
  0x4b   : > { %5130 = vmatmul.mubr.msk.f32.gmra.mxu1 %vm330_vm1, %v262_v57  ;;  %5186 = vmatmul.mubr.msk.f32.gmra.mxu0 %vm330_vm1, %v5962_v58  ;;  %v6158_v57 = vld [vmem:[%s5809_s13 + $0x11a] sm:$0xff] }
  0x4c   : > { %5132 = vmatprep.mubr.msk.f32.mxu1 %vm330_vm1, %v263_v59  ;;  %5188 = vmatprep.mubr.msk.f32.mxu0 %vm330_vm1, %v5966_v60  ;;  %v1904_v59 = vld [vmem:[%s5809_s13 + $0x13] sm:$0xff] }
  0x4f   : > { %5133 = vmatmul.mubr.msk.f32.gmra.mxu1 %vm330_vm1, %v264_v61  ;;  %5189 = vmatmul.mubr.msk.f32.gmra.mxu0 %vm330_vm1, %v5976_v62  ;;  %v1905_v61 = vld [vmem:[%s5809_s13 + $0x1b] sm:$0xff] }
  0x50   : > { %5135 = vmatprep.mubr.msk.f32.mxu1 %vm330_vm1, %v265_v63  ;;  %5191 = vmatprep.mubr.msk.f32.mxu0 %vm330_vm1, %v5980_v0  ;;  %v1906_v63 = vld [vmem:[%s5809_s13 + $0x23] sm:$0xff] }
  0x53   : > { %5136 = vmatmul.mubr.msk.f32.gmra.mxu1 %vm330_vm1, %v266_v1  ;;  %5192 = vmatmul.mubr.msk.f32.gmra.mxu0 %vm330_vm1, %v5990_v2  ;;  %v6175_v1 = vld [vmem:[%s7195_s1 + $0x1c] sm:$0xf] }
  0x54   : > { %5138 = vmatprep.mubr.msk.f32.mxu1 %vm330_vm1, %v267_v3  ;;  %5194 = vmatprep.mubr.msk.f32.mxu0 %vm330_vm1, %v5994_v4  ;;  %v1908_v3 = vld [vmem:[%s5809_s13 + $0x33] sm:$0xff] }
  0x57   : > { %5139 = vmatmul.mubr.msk.f32.gmra.mxu1 %vm330_vm1, %v268_v5  ;;  %5195 = vmatmul.mubr.msk.f32.gmra.mxu0 %vm330_vm1, %v6004_v6  ;;  %v1920_v5 = vld [vmem:[%s5809_s13 + $0x93] sm:$0xff] }
  0x58   : > { %5141 = vmatprep.mubr.msk.f32.mxu1 %vm330_vm1, %v269_v7  ;;  %5197 = vmatprep.mubr.msk.f32.mxu0 %vm330_vm1, %v6008_v8  ;;  %v1922_v7 = vld [vmem:[%s5809_s13 + $0xa3] sm:$0xff] }
  0x5b   : > { %5142 = vmatmul.mubr.msk.f32.gmra.mxu1 %vm330_vm1, %v270_v9  ;;  %5198 = vmatmul.mubr.msk.f32.gmra.mxu0 %vm330_vm1, %v6018_v10  ;;  %v1924_v9 = vld [vmem:[%s5809_s13 + $0xb3] sm:$0xff] }
  0x5c   : > { %5144 = vmatprep.mubr.msk.f32.mxu1 %vm330_vm1, %v271_v11  ;;  %5200 = vmatprep.mubr.msk.f32.mxu0 %vm330_vm1, %v6022_v12  ;;  %v1926_v11 = vld [vmem:[%s5809_s13 + $0xc3] sm:$0xff] }
  0x5f   : > { %5145 = vmatmul.mubr.msk.f32.gmra.mxu1 %vm330_vm1, %v272_v13  ;;  %5201 = vmatmul.mubr.msk.f32.gmra.mxu0 %vm330_vm1, %v6032_v14  ;;  %v1928_v13 = vld [vmem:[%s5809_s13 + $0xd3] sm:$0xff] }
  0x60   : > { %5147 = vmatprep.mubr.msk.f32.mxu1 %vm330_vm1, %v273_v15  ;;  %5203 = vmatprep.mubr.msk.f32.mxu0 %vm330_vm1, %v6036_v16  ;;  %v1930_v15 = vld [vmem:[%s5809_s13 + $0xe3] sm:$0xff] }
  0x63   : > { %5148 = vmatmul.mubr.msk.f32.gmra.mxu1 %vm330_vm1, %v274_v17  ;;  %5204 = vmatmul.mubr.msk.f32.gmra.mxu0 %vm330_vm1, %v6046_v18  ;;  %v1932_v17 = vld [vmem:[%s5809_s13 + $0xf3] sm:$0xff] }
  0x64   : > { %5150 = vmatprep.mubr.msk.f32.mxu1 %vm330_vm1, %v275_v19  ;;  %5206 = vmatprep.mubr.msk.f32.mxu0 %vm330_vm1, %v6050_v20  ;;  %v1934_v19 = vld [vmem:[%s5809_s13 + $0x103] sm:$0xff] }
  0x67   : > { %5151 = vmatmul.mubr.msk.f32.gmra.mxu1 %vm330_vm1, %v276_v21  ;;  %5207 = vmatmul.mubr.msk.f32.gmra.mxu0 %vm330_vm1, %v6060_v22  ;;  %v1936_v21 = vld [vmem:[%s5809_s13 + $0x113] sm:$0xff] }
  0x68   : > { %5153 = vmatprep.mubr.msk.f32.mxu1 %vm330_vm1, %v277_v23  ;;  %5209 = vmatprep.mubr.msk.f32.mxu0 %vm330_vm1, %v6064_v24  ;;  %v1508_v23 = vld [vmem:[%s5809_s13 + $0x122] sm:$0xff] }
  0x6b   : > { %5154 = vmatmul.mubr.msk.f32.gmra.mxu1 %vm330_vm1, %v278_v25  ;;  %5210 = vmatmul.mubr.msk.f32.gmra.mxu0 %vm330_vm1, %v6074_v26  ;;  %v1509_v25 = vld [vmem:[%s5809_s13 + $0x12a] sm:$0xff] }
  0x6c   : > { %5156 = vmatprep.mubr.msk.f32.mxu1 %vm330_vm1, %v279_v27  ;;  %5212 = vmatprep.mubr.msk.f32.mxu0 %vm330_vm1, %v6078_v28  ;;  %v2334_v27 = vld [vmem:[%s5809_s13 + $0x14] sm:$0xff] }
  0x6f   : > { %5157 = vmatmul.mubr.msk.f32.gmra.mxu1 %vm330_vm1, %v280_v29  ;;  %5213 = vmatmul.mubr.msk.f32.gmra.mxu0 %vm330_vm1, %v6088_v30  ;;  %v2335_v29 = vld [vmem:[%s5809_s13 + $0x1c] sm:$0xff] }
  0x70   : > { %5159 = vmatprep.mubr.msk.f32.mxu1 %vm330_vm1, %v281_v31  ;;  %5215 = vmatprep.mubr.msk.f32.mxu0 %vm330_vm1, %v6092_v32  ;;  %v2766_v31 = vld [vmem:[%s5809_s13 + $0x34] sm:$0xff] }
  0x73   : > { %5160 = vmatmul.mubr.msk.f32.gmra.mxu1 %vm330_vm1, %v282_v33  ;;  %5216 = vmatmul.mubr.msk.f32.gmra.mxu0 %vm330_vm1, %v6102_v34  ;;  %v2768_v33 = vld [vmem:[%s5809_s13 + $0x44] sm:$0xff] }
  0x74   : > { %5162 = vmatprep.mubr.msk.f32.mxu1 %vm330_vm1, %v283_v35  ;;  %5218 = vmatprep.mubr.msk.f32.mxu0 %vm330_vm1, %v6106_v36  ;;  %v2770_v35 = vld [vmem:[%s5809_s13 + $0x54] sm:$0xff] }
  0x77   : > { %5163 = vmatmul.mubr.msk.f32.gmra.mxu1 %vm330_vm1, %v284_v37  ;;  %5219 = vmatmul.mubr.msk.f32.gmra.mxu0 %vm330_vm1, %v6116_v38  ;;  %v2772_v37 = vld [vmem:[%s5809_s13 + $0x64] sm:$0xff] }
  0x78   : > { %5165 = vmatprep.mubr.msk.f32.mxu1 %vm330_vm1, %v285_v39  ;;  %5221 = vmatprep.mubr.msk.f32.mxu0 %vm330_vm1, %v6120_v40 }
  0x7b   : > { %5166 = vmatmul.mubr.msk.f32.gmra.mxu1 %vm330_vm1, %v286_v41  ;;  %5222 = vmatmul.mubr.msk.f32.gmra.mxu0 %vm330_vm1, %v6130_v42 }
  0x7c   : > { %5168 = vmatprep.mubr.msk.f32.mxu1 %vm330_vm1, %v287_v43  ;;  %5224 = vmatprep.mubr.msk.f32.mxu0 %vm330_vm1, %v6134_v44  ;;  %v2774_v43 = vld [vmem:[%s5809_s13 + $0x74] sm:$0xff] }
  0x7f   : > { %5169 = vmatmul.mubr.msk.f32.gmra.mxu1 %vm330_vm1, %v288_v45  ;;  %5225 = vmatmul.mubr.msk.f32.gmra.mxu0 %vm330_vm1, %v6144_v49 }
  0x80   : > { %5171 = vmatprep.mubr.msk.f32.mxu1 %vm330_vm1, %v289_v51  ;;  %5227 = vmatprep.mubr.msk.f32.mxu0 %vm330_vm1, %v6148_v53 }
  0x83   : > { %5172 = vmatmul.mubr.msk.f32.gmra.mxu1 %vm330_vm1, %v290_v55  ;;  %5228 = vmatmul.mubr.msk.f32.gmra.mxu0 %vm330_vm1, %v6158_v57  ;;  %v2776_v55 = vld [vmem:[%s5809_s13 + $0x84] sm:$0xff] }
  0x84   : > { %5232 = vmatprep.mubr.msk.f32.mxu1 %vm330_vm1, %v5907_v46  ;;  %5288 = vmatprep.mubr.msk.f32.mxu0 %vm330_vm1, %v1904_v59  ;;  %v6180_v46 = vld [vmem:[%s7195_s1 + $0x20] sm:$0xf] }
  0x87   : > { %5233 = vmatmul.mubr.msk.f32.vlgmr.msra.gmra.mxu1 %vm330_vm1, %v5927_v50  ;;  %5289 = vmatmul.mubr.msk.f32.vlgmr.msra.gmra.mxu0 %vm330_vm1, %v1905_v61  ;;  %v1907_v50 = vld [vmem:[%s5809_s13 + $0x2b] sm:$0xff] }
  0x88   : > { %5343 = vmatpush3.msk.msra.mxu1 %vm439_vm0, %v5914_v47  ;;  %5399 = vmatpush3.msk.msra.mxu0 %vm439_vm0, %v5919_v48  ;;  %v1909_v47 = vld [vmem:[%s5809_s13 + $0x3b] sm:$0xff]  ;;  %v1910_v48 = vld [vmem:[%s5809_s13 + $0x43] sm:$0xff]  ;;  %v2777_v61 = vld [vmem:[%s5809_s13 + $0x8c] sm:$0xff] }
  0x89   : > { %5235 = vmatprep.mubr.msk.f32.mxu1 %vm330_vm1, %v5934_v52  ;;  %5291 = vmatprep.mubr.msk.f32.mxu0 %vm330_vm1, %v1906_v63  ;;  %v1911_v52 = vld [vmem:[%s5809_s13 + $0x4b] sm:$0xff] }
  0x8a   : > { %5454 = vmatprep.subr.msk.mxu1 %vm439_vm0, %v6175_v1  ;;  %5510 = vmatprep.subr.msk.mxu0 %vm439_vm0, %v6180_v46 }
  0x8b   : > { %5236 = vmatmul.mubr.msk.f32.gmra.mxu1 %vm330_vm1, %v5948_v54  ;;  %5292 = vmatmul.mubr.msk.f32.gmra.mxu0 %vm330_vm1, %v1907_v50  ;;  %v1912_v54 = vld [vmem:[%s5809_s13 + $0x53] sm:$0xff] }
  0x8c   : > { %5238 = vmatprep.mubr.msk.f32.mxu1 %vm330_vm1, %v5952_v56  ;;  %5294 = vmatprep.mubr.msk.f32.mxu0 %vm330_vm1, %v1908_v3  ;;  %v1913_v56 = vld [vmem:[%s5809_s13 + $0x5b] sm:$0xff] }
  0x8f   : > { %5239 = vmatmul.mubr.msk.f32.gmra.mxu1 %vm330_vm1, %v5962_v58  ;;  %5295 = vmatmul.mubr.msk.f32.gmra.mxu0 %vm330_vm1, %v1909_v47  ;;  %v1914_v58 = vld [vmem:[%s5809_s13 + $0x63] sm:$0xff] }
  0x90   : > { %5241 = vmatprep.mubr.msk.f32.mxu1 %vm330_vm1, %v5966_v60  ;;  %5297 = vmatprep.mubr.msk.f32.mxu0 %vm330_vm1, %v1910_v48  ;;  %v1915_v60 = vld [vmem:[%s5809_s13 + $0x6b] sm:$0xff]  ;;  %v2779_v47 = vld [vmem:[%s5809_s13 + $0x9c] sm:$0xff] }
  0x93   : > { %5242 = vmatmul.mubr.msk.f32.gmra.mxu1 %vm330_vm1, %v5976_v62  ;;  %5298 = vmatmul.mubr.msk.f32.gmra.mxu0 %vm330_vm1, %v1911_v52  ;;  %v1916_v62 = vld [vmem:[%s5809_s13 + $0x73] sm:$0xff] }
  0x94   : > { %5244 = vmatprep.mubr.msk.f32.mxu1 %vm330_vm1, %v5980_v0  ;;  %5300 = vmatprep.mubr.msk.f32.mxu0 %vm330_vm1, %v1912_v54  ;;  %v1917_v0 = vld [vmem:[%s5809_s13 + $0x7b] sm:$0xff]  ;;  %v2780_v54 = vld [vmem:[%s5809_s13 + $0xa4] sm:$0xff] }
  0x97   : > { %5245 = vmatmul.mubr.msk.f32.gmra.mxu1 %vm330_vm1, %v5990_v2  ;;  %5301 = vmatmul.mubr.msk.f32.gmra.mxu0 %vm330_vm1, %v1913_v56  ;;  %v1918_v2 = vld [vmem:[%s5809_s13 + $0x83] sm:$0xff] }
  0x98   : > { %5247 = vmatprep.mubr.msk.f32.mxu1 %vm330_vm1, %v5994_v4  ;;  %5303 = vmatprep.mubr.msk.f32.mxu0 %vm330_vm1, %v1914_v58  ;;  %v1919_v4 = vld [vmem:[%s5809_s13 + $0x8b] sm:$0xff] }
  0x9b   : > { %5248 = vmatmul.mubr.msk.f32.gmra.mxu1 %vm330_vm1, %v6004_v6  ;;  %5304 = vmatmul.mubr.msk.f32.gmra.mxu0 %vm330_vm1, %v1915_v60  ;;  %v1921_v6 = vld [vmem:[%s5809_s13 + $0x9b] sm:$0xff]  ;;  %v2781_v60 = vld [vmem:[%s5809_s13 + $0xac] sm:$0xff] }
  0x9c   : > { %5250 = vmatprep.mubr.msk.f32.mxu1 %vm330_vm1, %v6008_v8  ;;  %5306 = vmatprep.mubr.msk.f32.mxu0 %vm330_vm1, %v1916_v62  ;;  %v1923_v8 = vld [vmem:[%s5809_s13 + $0xab] sm:$0xff] }
  0x9f   : > { %5251 = vmatmul.mubr.msk.f32.gmra.mxu1 %vm330_vm1, %v6018_v10  ;;  %5307 = vmatmul.mubr.msk.f32.gmra.mxu0 %vm330_vm1, %v1917_v0  ;;  %v1925_v10 = vld [vmem:[%s5809_s13 + $0xbb] sm:$0xff] }
  0xa0   : > { %5253 = vmatprep.mubr.msk.f32.mxu1 %vm330_vm1, %v6022_v12  ;;  %5309 = vmatprep.mubr.msk.f32.mxu0 %vm330_vm1, %v1918_v2  ;;  %v1927_v12 = vld [vmem:[%s5809_s13 + $0xcb] sm:$0xff]  ;;  %v2782_v2 = vld [vmem:[%s5809_s13 + $0xb4] sm:$0xff] }
  0xa3   : > { %5254 = vmatmul.mubr.msk.f32.gmra.mxu1 %vm330_vm1, %v6032_v14  ;;  %5310 = vmatmul.mubr.msk.f32.gmra.mxu0 %vm330_vm1, %v1919_v4  ;;  %v1929_v14 = vld [vmem:[%s5809_s13 + $0xdb] sm:$0xff] }
  0xa4   : > { %5256 = vmatprep.mubr.msk.f32.mxu1 %vm330_vm1, %v6036_v16  ;;  %5312 = vmatprep.mubr.msk.f32.mxu0 %vm330_vm1, %v1920_v5  ;;  %v1931_v16 = vld [vmem:[%s5809_s13 + $0xeb] sm:$0xff] }
  0xa7   : > { %5257 = vmatmul.mubr.msk.f32.gmra.mxu1 %vm330_vm1, %v6046_v18  ;;  %5313 = vmatmul.mubr.msk.f32.gmra.mxu0 %vm330_vm1, %v1921_v6  ;;  %v1933_v18 = vld [vmem:[%s5809_s13 + $0xfb] sm:$0xff] }
  0xa8   : > { %5259 = vmatprep.mubr.msk.f32.mxu1 %vm330_vm1, %v6050_v20  ;;  %5315 = vmatprep.mubr.msk.f32.mxu0 %vm330_vm1, %v1922_v7  ;;  %v1935_v20 = vld [vmem:[%s5809_s13 + $0x10b] sm:$0xff]  ;;  %v2783_v6 = vld [vmem:[%s5809_s13 + $0xbc] sm:$0xff] }
  0xab   : > { %5260 = vmatmul.mubr.msk.f32.gmra.mxu1 %vm330_vm1, %v6060_v22  ;;  %5316 = vmatmul.mubr.msk.f32.gmra.mxu0 %vm330_vm1, %v1923_v8  ;;  %v1937_v22 = vld [vmem:[%s5809_s13 + $0x11b] sm:$0xff] }
  0xac   : > { %5262 = vmatprep.mubr.msk.f32.mxu1 %vm330_vm1, %v6064_v24  ;;  %5318 = vmatprep.mubr.msk.f32.mxu0 %vm330_vm1, %v1924_v9  ;;  %v1938_v24 = vld [vmem:[%s5809_s13 + $0x123] sm:$0xff] }
  0xad   : > { %v2784_v9 = vld [vmem:[%s5809_s13 + $0xc4] sm:$0xff] }
  0xaf   : > { %5263 = vmatmul.mubr.msk.f32.gmra.mxu1 %vm330_vm1, %v6074_v26  ;;  %5319 = vmatmul.mubr.msk.f32.gmra.mxu0 %vm330_vm1, %v1925_v10  ;;  %v1939_v26 = vld [vmem:[%s5809_s13 + $0x12b] sm:$0xff] }
  0xb0   : > { %5265 = vmatprep.mubr.msk.f32.mxu1 %vm330_vm1, %v6078_v28  ;;  %5321 = vmatprep.mubr.msk.f32.mxu0 %vm330_vm1, %v1926_v11  ;;  %v2764_v28 = vld [vmem:[%s5809_s13 + $0x24] sm:$0xff] }
  0xb3   : > { %5266 = vmatmul.mubr.msk.f32.gmra.mxu1 %vm330_vm1, %v6088_v30  ;;  %5322 = vmatmul.mubr.msk.f32.gmra.mxu0 %vm330_vm1, %v1927_v12  ;;  %v2765_v30 = vld [vmem:[%s5809_s13 + $0x2c] sm:$0xff] }
  0xb4   : > { %5268 = vmatprep.mubr.msk.f32.mxu1 %vm330_vm1, %v6092_v32  ;;  %5324 = vmatprep.mubr.msk.f32.mxu0 %vm330_vm1, %v1928_v13  ;;  %v2767_v32 = vld [vmem:[%s5809_s13 + $0x3c] sm:$0xff]  ;;  %v2785_v12 = vld [vmem:[%s5809_s13 + $0xcc] sm:$0xff] }
  0xb7   : > { %5269 = vmatmul.mubr.msk.f32.gmra.mxu1 %vm330_vm1, %v6102_v34  ;;  %5325 = vmatmul.mubr.msk.f32.gmra.mxu0 %vm330_vm1, %v1929_v14  ;;  %v2769_v34 = vld [vmem:[%s5809_s13 + $0x4c] sm:$0xff] }
  0xb8   : > { %5271 = vmatprep.mubr.msk.f32.mxu1 %vm330_vm1, %v6106_v36  ;;  %5327 = vmatprep.mubr.msk.f32.mxu0 %vm330_vm1, %v1930_v15  ;;  %v2771_v36 = vld [vmem:[%s5809_s13 + $0x5c] sm:$0xff]  ;;  %v2786_v15 = vld [vmem:[%s5809_s13 + $0xd4] sm:$0xff] }
  0xbb   : > { %5272 = vmatmul.mubr.msk.f32.gmra.mxu1 %vm330_vm1, %v6116_v38  ;;  %5328 = vmatmul.mubr.msk.f32.gmra.mxu0 %vm330_vm1, %v1931_v16 }
  0xbc   : > { %5274 = vmatprep.mubr.msk.f32.mxu1 %vm330_vm1, %v6120_v40  ;;  %5330 = vmatprep.mubr.msk.f32.mxu0 %vm330_vm1, %v1932_v17  ;;  %v2773_v40 = vld [vmem:[%s5809_s13 + $0x6c] sm:$0xff] }
  0xbf   : > { %5275 = vmatmul.mubr.msk.f32.gmra.mxu1 %vm330_vm1, %v6130_v42  ;;  %5331 = vmatmul.mubr.msk.f32.gmra.mxu0 %vm330_vm1, %v1933_v18  ;;  %v2787_v18 = vld [vmem:[%s5809_s13 + $0xdc] sm:$0xff] }
  0xc0   : > { %5277 = vmatprep.mubr.msk.f32.mxu1 %vm330_vm1, %v6134_v44  ;;  %5333 = vmatprep.mubr.msk.f32.mxu0 %vm330_vm1, %v1934_v19 }
  0xc3   : > { %5278 = vmatmul.mubr.msk.f32.gmra.mxu1 %vm330_vm1, %v6144_v49  ;;  %5334 = vmatmul.mubr.msk.f32.gmra.mxu0 %vm330_vm1, %v1935_v20  ;;  %v2775_v49 = vld [vmem:[%s5809_s13 + $0x7c] sm:$0xff] }
  0xc4   : > { %5280 = vmatprep.mubr.msk.f32.mxu1 %vm330_vm1, %v6148_v53  ;;  %5336 = vmatprep.mubr.msk.f32.mxu0 %vm330_vm1, %v1936_v21  ;;  %v2788_v21 = vld [vmem:[%s5809_s13 + $0xe4] sm:$0xff] }
  0xc7   : > { %5281 = vmatmul.mubr.msk.f32.gmra.mxu1 %vm330_vm1, %v6158_v57  ;;  %5337 = vmatmul.mubr.msk.f32.gmra.mxu0 %vm330_vm1, %v1937_v22 }
  0xc8   : > { %5283 = vmatprep.mubr.msk.f32.mxu1 %vm330_vm1, %v1508_v23  ;;  %5339 = vmatprep.mubr.msk.f32.mxu0 %vm330_vm1, %v1938_v24  ;;  %v2789_v24 = vld [vmem:[%s5809_s13 + $0xec] sm:$0xff] }
  0xcb   : > { %5284 = vmatmul.mubr.msk.f32.gmra.mxu1 %vm330_vm1, %v1509_v25  ;;  %5340 = vmatmul.mubr.msk.f32.gmra.mxu0 %vm330_vm1, %v1939_v26 }
  0xcc   : > { %5344 = vmatprep.mubr.msk.f32.mxu1 %vm330_vm1, %v2334_v27  ;;  %5400 = vmatprep.mubr.msk.f32.mxu0 %vm330_vm1, %v2764_v28  ;;  %v2790_v27 = vld [vmem:[%s5809_s13 + $0xf4] sm:$0xff] }
  0xcf   : > { %5345 = vmatmul.mubr.msk.f32.vlgmr.msra.gmra.mxu1 %vm330_vm1, %v2335_v29  ;;  %5401 = vmatmul.mubr.msk.f32.vlgmr.msra.gmra.mxu0 %vm330_vm1, %v2765_v30 }
  0xd0   : > { %5455 = vmatpush3.msk.msra.mxu1 %vm439_vm0, %v6175_v1  ;;  %5511 = vmatpush3.msk.msra.mxu0 %vm439_vm0, %v6180_v46  ;;  %v2778_v46 = vld [vmem:[%s5809_s13 + $0x94] sm:$0xff] }
  0xd1   : > { %5347 = vmatprep.mubr.msk.f32.mxu1 %vm330_vm1, %v2764_v28  ;;  %5403 = vmatprep.mubr.msk.f32.mxu0 %vm330_vm1, %v2766_v31 }
  0xd3   : > { %5348 = vmatmul.mubr.msk.f32.gmra.mxu1 %vm330_vm1, %v2765_v30  ;;  %5404 = vmatmul.mubr.msk.f32.gmra.mxu0 %vm330_vm1, %v2767_v32 }
  0xd4   : > { %5350 = vmatprep.mubr.msk.f32.mxu1 %vm330_vm1, %v2766_v31  ;;  %5406 = vmatprep.mubr.msk.f32.mxu0 %vm330_vm1, %v2768_v33  ;;  %v2791_v31 = vld [vmem:[%s5809_s13 + $0xfc] sm:$0xff] }
  0xd7   : > { %5351 = vmatmul.mubr.msk.f32.gmra.mxu1 %vm330_vm1, %v2767_v32  ;;  %5407 = vmatmul.mubr.msk.f32.gmra.mxu0 %vm330_vm1, %v2769_v34 }
  0xd8   : > { %5353 = vmatprep.mubr.msk.f32.mxu1 %vm330_vm1, %v2768_v33  ;;  %5409 = vmatprep.mubr.msk.f32.mxu0 %vm330_vm1, %v2770_v35 }
  0xdb   : > { %v6354_v38 = vpop.f32.mrf.mxu0  ;;  %v6356_v39 = vpop.f32.mrf.mxu1  ;;  %5354 = vmatmul.mubr.msk.f32.gmra.mxu1 %vm330_vm1, %v2769_v34  ;;  %5410 = vmatmul.mubr.msk.f32.gmra.mxu0 %vm330_vm1, %v2771_v36  ;;  %v2792_v34 = vld [vmem:[%s5809_s13 + $0x104] sm:$0xff] }
  0xdc   : > { %5356 = vmatprep.mubr.msk.f32.mxu1 %vm330_vm1, %v2770_v35  ;;  %5412 = vmatprep.mubr.msk.f32.mxu0 %vm330_vm1, %v2772_v37 }
  0xdd   : > { %v6363_v41 = vpop.f32.mrf.mxu0  ;;  %v6365_v42 = vpop.f32.mrf.mxu1 }
  0xdf   : > { %v6368_v44 = vpop.f32.mrf.mxu0  ;;  %v6370_v45 = vpop.f32.mrf.mxu1  ;;  %5357 = vmatmul.mubr.msk.f32.gmra.mxu1 %vm330_vm1, %v2771_v36  ;;  %5413 = vmatmul.mubr.msk.f32.gmra.mxu0 %vm330_vm1, %v2773_v40 }
  0xe0   : > { %5359 = vmatprep.mubr.msk.f32.mxu1 %vm330_vm1, %v2772_v37  ;;  %5415 = vmatprep.mubr.msk.f32.mxu0 %vm330_vm1, %v2774_v43 }
  0xe1   : > { %v6377_v51 = vpop.f32.mrf.mxu0  ;;  %v6379_v53 = vpop.f32.mrf.mxu1 }
  0xe3   : > { %v6382_v57 = vpop.f32.mrf.mxu0  ;;  %v6384_v59 = vpop.f32.mrf.mxu1  ;;  %5360 = vmatmul.mubr.msk.f32.gmra.mxu1 %vm330_vm1, %v2773_v40  ;;  %5416 = vmatmul.mubr.msk.f32.gmra.mxu0 %vm330_vm1, %v2775_v49 }
  0xe4   : > { %5362 = vmatprep.mubr.msk.f32.mxu1 %vm330_vm1, %v2774_v43  ;;  %5418 = vmatprep.mubr.msk.f32.mxu0 %vm330_vm1, %v2776_v55 }
  0xe5   : > { %v6391_v63 = vpop.f32.mrf.mxu0  ;;  %v6393_v1 = vpop.f32.mrf.mxu1 }
  0xe7   : > { %v6396_v50 = vpop.f32.mrf.mxu0  ;;  %v6398_v3 = vpop.f32.mrf.mxu1  ;;  %5363 = vmatmul.mubr.msk.f32.gmra.mxu1 %vm330_vm1, %v2775_v49  ;;  %5419 = vmatmul.mubr.msk.f32.gmra.mxu0 %vm330_vm1, %v2777_v61  ;;  %v2793_v49 = vld [vmem:[%s5809_s13 + $0x10c] sm:$0xff] }
  0xe8   : > { %5365 = vmatprep.mubr.msk.f32.mxu1 %vm330_vm1, %v2776_v55  ;;  %5421 = vmatprep.mubr.msk.f32.mxu0 %vm330_vm1, %v2778_v46 }
  0xe9   : > { %v6405_v48 = vpop.f32.mrf.mxu0  ;;  %v6407_v52 = vpop.f32.mrf.mxu1 }
  0xeb   : > { %v6410_v56 = vpop.f32.mrf.mxu0  ;;  %v6412_v58 = vpop.f32.mrf.mxu1  ;;  %5366 = vmatmul.mubr.msk.f32.gmra.mxu1 %vm330_vm1, %v2777_v61  ;;  %5422 = vmatmul.mubr.msk.f32.gmra.mxu0 %vm330_vm1, %v2779_v47 }
  0xec   : > { %5368 = vmatprep.mubr.msk.f32.mxu1 %vm330_vm1, %v2778_v46  ;;  %5424 = vmatprep.mubr.msk.f32.mxu0 %vm330_vm1, %v2780_v54 }
  0xed   : > { %v6419_v62 = vpop.f32.mrf.mxu0  ;;  %v6421_v0 = vpop.f32.mrf.mxu1 }
  0xef   : > { %v6424_v4 = vpop.f32.mrf.mxu0  ;;  %v6426_v5 = vpop.f32.mrf.mxu1  ;;  %5369 = vmatmul.mubr.msk.f32.gmra.mxu1 %vm330_vm1, %v2779_v47  ;;  %5425 = vmatmul.mubr.msk.f32.gmra.mxu0 %vm330_vm1, %v2781_v60 }
  0xf0   : > { %5371 = vmatprep.mubr.msk.f32.mxu1 %vm330_vm1, %v2780_v54  ;;  %5427 = vmatprep.mubr.msk.f32.mxu0 %vm330_vm1, %v2782_v2 }
  0xf1   : > { %v6433_v7 = vpop.f32.mrf.mxu0  ;;  %v6435_v8 = vpop.f32.mrf.mxu1 }
  0xf3   : > { %v6438_v10 = vpop.f32.mrf.mxu0  ;;  %v6440_v11 = vpop.f32.mrf.mxu1  ;;  %5372 = vmatmul.mubr.msk.f32.gmra.mxu1 %vm330_vm1, %v2781_v60  ;;  %5428 = vmatmul.mubr.msk.f32.gmra.mxu0 %vm330_vm1, %v2783_v6 }
  0xf4   : > { %5374 = vmatprep.mubr.msk.f32.mxu1 %vm330_vm1, %v2782_v2  ;;  %5430 = vmatprep.mubr.msk.f32.mxu0 %vm330_vm1, %v2784_v9 }
  0xf5   : > { %v6447_v13 = vpop.f32.mrf.mxu0  ;;  %v6449_v14 = vpop.f32.mrf.mxu1 }
  0xf7   : > { %v6452_v16 = vpop.f32.mrf.mxu0  ;;  %v6454_v17 = vpop.f32.mrf.mxu1  ;;  %5375 = vmatmul.mubr.msk.f32.gmra.mxu1 %vm330_vm1, %v2783_v6  ;;  %5431 = vmatmul.mubr.msk.f32.gmra.mxu0 %vm330_vm1, %v2785_v12  ;;  %v2795_v6 = vld [vmem:[%s5809_s13 + $0x11c] sm:$0xff] }
  0xf8   : > { %5377 = vmatprep.mubr.msk.f32.mxu1 %vm330_vm1, %v2784_v9  ;;  %5433 = vmatprep.mubr.msk.f32.mxu0 %vm330_vm1, %v2786_v15 }
  0xf9   : > { %v6461_v19 = vpop.f32.mrf.mxu0  ;;  %v6463_v20 = vpop.f32.mrf.mxu1 }
  0xfb   : > { %v6466_v22 = vpop.f32.mrf.mxu0  ;;  %v6468_v23 = vpop.f32.mrf.mxu1  ;;  %5378 = vmatmul.mubr.msk.f32.gmra.mxu1 %vm330_vm1, %v2785_v12  ;;  %5434 = vmatmul.mubr.msk.f32.gmra.mxu0 %vm330_vm1, %v2787_v18 }
  0xfc   : > { %5380 = vmatprep.mubr.msk.f32.mxu1 %vm330_vm1, %v2786_v15  ;;  %5436 = vmatprep.mubr.msk.f32.mxu0 %vm330_vm1, %v2788_v21 }
  0xfd   : > { %v6475_v25 = vpop.f32.mrf.mxu0  ;;  %v6477_v26 = vpop.f32.mrf.mxu1 }
  0xff   : > { %v5122_v28 = vpop.f32.mrf.mxu1  ;;  %v5178_v29 = vpop.f32.mrf.mxu0  ;;  %5381 = vmatmul.mubr.msk.f32.gmra.mxu1 %vm330_vm1, %v2787_v18  ;;  %5437 = vmatmul.mubr.msk.f32.gmra.mxu0 %vm330_vm1, %v2789_v24 }
 0x100   : > { %v871_v30 = vadd.f32 %v5122_v28, %v6354_v38  ;;  %5383 = vmatprep.mubr.msk.f32.mxu1 %vm330_vm1, %v2788_v21  ;;  %5439 = vmatprep.mubr.msk.f32.mxu0 %vm330_vm1, %v2790_v27  ;;  %v2797_v28 = vld [vmem:[%s5809_s13 + $0x12c] sm:$0xff] }
 0x101   : > { %v865_v32 = vpop.f32.mrf.mxu1  ;;  %v1259_v33 = vpop.f32.mrf.mxu0 }
 0x102   : > { %v6487_v35 = vadd.f32 %v5178_v29, %v871_v30  ;;  %v866_v36 = vadd.f32 %v865_v32, %v6363_v41  ;;  %v2794_v41 = vld [vmem:[%s5809_s13 + $0x114] sm:$0xff] }
 0x103   : > { %v5125_v37 = vpop.f32.mrf.mxu1  ;;  %v5181_v40 = vpop.f32.mrf.mxu0  ;;  %5384 = vmatmul.mubr.msk.f32.gmra.mxu1 %vm330_vm1, %v2789_v24  ;;  %5440 = vmatmul.mubr.msk.f32.gmra.mxu0 %vm330_vm1, %v2791_v31 }
 0x104   : > { %v6492_v38 = vadd.f32 %v1259_v33, %v866_v36  ;;  %v881_v43 = vadd.f32 %v5125_v37, %v6368_v44  ;;  %5386 = vmatprep.mubr.msk.f32.mxu1 %vm330_vm1, %v2790_v27  ;;  %5442 = vmatprep.mubr.msk.f32.mxu0 %vm330_vm1, %v2792_v34  ;;  %v2799_v37 = vld [vmem:[%s5809_s13 + $0x13c] sm:$0xff] }
 0x105   : > { %v875_v55 = vpop.f32.mrf.mxu1  ;;  %v1269_v61 = vpop.f32.mrf.mxu0 }
 0x106   : > { %v6499_v46 = vadd.f32 %v5181_v40, %v881_v43  ;;  %v876_v47 = vadd.f32 %v875_v55, %v6377_v51  ;;  %v2796_v51 = vld [vmem:[%s5809_s13 + $0x124] sm:$0xff] }
 0x107   : > { %v5128_v54 = vpop.f32.mrf.mxu1  ;;  %v5184_v60 = vpop.f32.mrf.mxu0  ;;  %5387 = vmatmul.mubr.msk.f32.gmra.mxu1 %vm330_vm1, %v2791_v31  ;;  %5443 = vmatmul.mubr.msk.f32.gmra.mxu0 %vm330_vm1, %v2793_v49 }
 0x108   : > { %v6504_v44 = vadd.f32 %v1269_v61, %v876_v47  ;;  %v891_v2 = vadd.f32 %v5128_v54, %v6382_v57  ;;  %5389 = vmatprep.mubr.msk.f32.mxu1 %vm330_vm1, %v2792_v34  ;;  %5445 = vmatprep.mubr.msk.f32.mxu0 %vm330_vm1, %v2794_v41 }
 0x109   : > { %v885_v9 = vpop.f32.mrf.mxu1  ;;  %v1279_v12 = vpop.f32.mrf.mxu0 }
 0x10a   : > { %v6511_v15 = vadd.f32 %v5184_v60, %v891_v2  ;;  %v886_v18 = vadd.f32 %v885_v9, %v6391_v63  ;;  %v2798_v63 = vld [vmem:[%s5809_s13 + $0x134] sm:$0xff] }
 0x10b   : > { %v5131_v21 = vpop.f32.mrf.mxu1  ;;  %v5187_v24 = vpop.f32.mrf.mxu0  ;;  %5390 = vmatmul.mubr.msk.f32.gmra.mxu1 %vm330_vm1, %v2793_v49  ;;  %5446 = vmatmul.mubr.msk.f32.gmra.mxu0 %vm330_vm1, %v2795_v6  ;;  %v3624_v49 = vld [vmem:[%s5809_s13 + $0x26] sm:$0xff]  ;;  %v3625_v2 = vld [vmem:[%s5809_s13 + $0x2e] sm:$0xff] }
 0x10c   : > { %v6516_v57 = vadd.f32 %v1279_v12, %v886_v18  ;;  %v901_v27 = vadd.f32 %v5131_v21, %v6396_v50  ;;  %5392 = vmatprep.mubr.msk.f32.mxu1 %vm330_vm1, %v2794_v41  ;;  %5448 = vmatprep.mubr.msk.f32.mxu0 %vm330_vm1, %v2796_v51  ;;  %v3195_v60 = vld [vmem:[%s5809_s13 + $0x2d] sm:$0xff]  ;;  %v3196_v9 = vld [vmem:[%s5809_s13 + $0x35] sm:$0xff] }
 0x10d   : > { %v895_v29 = vpop.f32.mrf.mxu1  ;;  %v1289_v30 = vpop.f32.mrf.mxu0  ;;  %v3626_v12 = vld [vmem:[%s5809_s13 + $0x36] sm:$0xff] }
 0x10e   : > { %v6523_v31 = vadd.f32 %v5187_v24, %v901_v27  ;;  %v896_v32 = vadd.f32 %v895_v29, %v6405_v48  ;;  %v3194_v48 = vld [vmem:[%s5809_s13 + $0x25] sm:$0xff] }
 0x10f   : > { %v5134_v33 = vpop.f32.mrf.mxu1  ;;  %v5190_v34 = vpop.f32.mrf.mxu0  ;;  %5393 = vmatmul.mubr.msk.f32.gmra.mxu1 %vm330_vm1, %v2795_v6  ;;  %5449 = vmatmul.mubr.msk.f32.gmra.mxu0 %vm330_vm1, %v2797_v28  ;;  %v3627_v29 = vld [vmem:[%s5809_s13 + $0x3e] sm:$0xff] }
 0x110   : > { %v6528_v50 = vadd.f32 %v1289_v30, %v896_v32  ;;  %v911_v36 = vadd.f32 %v5134_v33, %v6410_v56  ;;  %5395 = vmatprep.mubr.msk.f32.mxu1 %vm330_vm1, %v2796_v51  ;;  %5451 = vmatprep.mubr.msk.f32.mxu0 %vm330_vm1, %v2798_v63  ;;  %v3198_v63 = vld [vmem:[%s5809_s13 + $0x45] sm:$0xff] }
 0x111   : > { %v905_v40 = vpop.f32.mrf.mxu1  ;;  %v1299_v43 = vpop.f32.mrf.mxu0  ;;  %v3628_v32 = vld [vmem:[%s5809_s13 + $0x46] sm:$0xff] }
 0x112   : > { %v6536_v55 = vadd.f32 %v5190_v34, %v911_v36  ;;  %v906_v61 = vadd.f32 %v905_v40, %v6419_v62 }
 0x113   : > { %v5137_v41 = vpop.f32.mrf.mxu1  ;;  %v5193_v47 = vpop.f32.mrf.mxu0  ;;  %5396 = vmatmul.mubr.msk.f32.gmra.mxu1 %vm330_vm1, %v2797_v28  ;;  %5452 = vmatmul.mubr.msk.f32.gmra.mxu0 %vm330_vm1, %v2799_v37  ;;  %v3197_v28 = vld [vmem:[%s5809_s13 + $0x3d] sm:$0xff] }
 0x114   : > { %v6541_v56 = vadd.f32 %v1299_v43, %v906_v61  ;;  %v921_v54 = vadd.f32 %v5137_v41, %v6424_v4  ;;  %5456 = vmatprep.mubr.msk.f32.mxu1 %vm330_vm1, %v3194_v48  ;;  %5512 = vmatprep.mubr.msk.f32.mxu0 %vm330_vm1, %v3624_v49  ;;  %v3199_v43 = vld [vmem:[%s5809_s13 + $0x4d] sm:$0xff]  ;;  %v3200_v61 = vld [vmem:[%s5809_s13 + $0x55] sm:$0xff] }
 0x115   : > { %v915_v6 = vpop.f32.mrf.mxu1  ;;  %v1309_v62 = vpop.f32.mrf.mxu0  ;;  %v3629_v48 = vld [vmem:[%s5809_s13 + $0x4e] sm:$0xff]  ;;  %v3630_v41 = vld [vmem:[%s5809_s13 + $0x56] sm:$0xff] }
 0x116   : > { %v6550_v51 = vadd.f32 %v5193_v47, %v921_v54  ;;  %v916_v18 = vadd.f32 %v915_v6, %v6433_v7 }
 0x117   : > { %v5140_v21 = vpop.f32.mrf.mxu1  ;;  %v5196_v4 = vpop.f32.mrf.mxu0  ;;  %5457 = vmatmul.mubr.msk.f32.vlgmr.msra.gmra.mxu1 %vm330_vm1, %v3195_v60  ;;  %5513 = vmatmul.mubr.msk.f32.vlgmr.msra.gmra.mxu0 %vm330_vm1, %v3625_v2 }
 0x118   : > { %v6555_v24 = vadd.f32 %v1309_v62, %v916_v18  ;;  %v931_v27 = vadd.f32 %v5140_v21, %v6438_v10  ;;  %5459 = vmatprep.mubr.msk.f32.mxu1 %vm330_vm1, %v3196_v9  ;;  %5515 = vmatprep.mubr.msk.f32.mxu0 %vm330_vm1, %v3626_v12  ;;  %v3201_v62 = vld [vmem:[%s5809_s13 + $0x5d] sm:$0xff]  ;;  %v3202_v18 = vld [vmem:[%s5809_s13 + $0x65] sm:$0xff] }
 0x119   : > { %v925_v30 = vpop.f32.mrf.mxu1  ;;  %v1319_v7 = vpop.f32.mrf.mxu0  ;;  %v3631_v9 = vld [vmem:[%s5809_s13 + $0x5e] sm:$0xff]  ;;  %v3632_v21 = vld [vmem:[%s5809_s13 + $0x66] sm:$0xff] }
 0x11a   : > { %v6564_v33 = vadd.f32 %v5196_v4, %v931_v27  ;;  %v926_v34 = vadd.f32 %v925_v30, %v6447_v13 }
 0x11b   : > { %v5143_v36 = vpop.f32.mrf.mxu1  ;;  %v5199_v10 = vpop.f32.mrf.mxu0  ;;  %5460 = vmatmul.mubr.msk.f32.gmra.mxu1 %vm330_vm1, %v3197_v28  ;;  %5516 = vmatmul.mubr.msk.f32.gmra.mxu0 %vm330_vm1, %v3627_v29 }
 0x11c   : > { %v6569_v37 = vadd.f32 %v1319_v7, %v926_v34  ;;  %v941_v40 = vadd.f32 %v5143_v36, %v6452_v16  ;;  %5462 = vmatprep.mubr.msk.f32.mxu1 %vm330_vm1, %v3198_v63  ;;  %5518 = vmatprep.mubr.msk.f32.mxu0 %vm330_vm1, %v3628_v32  ;;  %v3203_v7 = vld [vmem:[%s5809_s13 + $0x6d] sm:$0xff]  ;;  %v3204_v34 = vld [vmem:[%s5809_s13 + $0x75] sm:$0xff] }
 0x11d   : > { %v935_v49 = vpop.f32.mrf.mxu1  ;;  %v1329_v13 = vpop.f32.mrf.mxu0  ;;  %v3633_v63 = vld [vmem:[%s5809_s13 + $0x6e] sm:$0xff]  ;;  %v3634_v36 = vld [vmem:[%s5809_s13 + $0x76] sm:$0xff] }
 0x11e   : > { %v6578_v47 = vadd.f32 %v5199_v10, %v941_v40  ;;  %v936_v54 = vadd.f32 %v935_v49, %v6461_v19 }
 0x11f   : > { %v5146_v60 = vpop.f32.mrf.mxu1  ;;  %v5202_v16 = vpop.f32.mrf.mxu0  ;;  %5463 = vmatmul.mubr.msk.f32.gmra.mxu1 %vm330_vm1, %v3199_v43  ;;  %5519 = vmatmul.mubr.msk.f32.gmra.mxu0 %vm330_vm1, %v3629_v48 }
 0x120   : > { %v6583_v2 = vadd.f32 %v1329_v13, %v936_v54  ;;  %v951_v6 = vadd.f32 %v5146_v60, %v6466_v22  ;;  %5465 = vmatprep.mubr.msk.f32.mxu1 %vm330_vm1, %v3200_v61  ;;  %5521 = vmatprep.mubr.msk.f32.mxu0 %vm330_vm1, %v3630_v41  ;;  %v3205_v13 = vld [vmem:[%s5809_s13 + $0x7d] sm:$0xff]  ;;  %v3206_v54 = vld [vmem:[%s5809_s13 + $0x85] sm:$0xff] }
 0x121   : > { %v945_v12 = vpop.f32.mrf.mxu1  ;;  %v1339_v19 = vpop.f32.mrf.mxu0  ;;  %v3635_v61 = vld [vmem:[%s5809_s13 + $0x7e] sm:$0xff]  ;;  %v3636_v60 = vld [vmem:[%s5809_s13 + $0x86] sm:$0xff] }
 0x122   : > { %v6592_v4 = vadd.f32 %v5202_v16, %v951_v6  ;;  %v946_v27 = vadd.f32 %v945_v12, %v6475_v25 }
 0x123   : > { %v5149_v28 = vpop.f32.mrf.mxu1  ;;  %v5205_v22 = vpop.f32.mrf.mxu0  ;;  %5466 = vmatmul.mubr.msk.f32.gmra.mxu1 %vm330_vm1, %v3201_v62  ;;  %5522 = vmatmul.mubr.msk.f32.gmra.mxu0 %vm330_vm1, %v3631_v9 }
 0x124   : > { %v6597_v29 = vadd.f32 %v1339_v19, %v946_v27  ;;  %v961_v30 = vadd.f32 %v5149_v28, %v6356_v39  ;;  %5468 = vmatprep.mubr.msk.f32.mxu1 %vm330_vm1, %v3202_v18  ;;  %5524 = vmatprep.mubr.msk.f32.mxu0 %vm330_vm1, %v3632_v21  ;;  %v3207_v19 = vld [vmem:[%s5809_s13 + $0x8d] sm:$0xff]  ;;  %v3208_v27 = vld [vmem:[%s5809_s13 + $0x95] sm:$0xff] }
 0x125   : > { %v955_v32 = vpop.f32.mrf.mxu1  ;;  %v1349_v25 = vpop.f32.mrf.mxu0  ;;  %v3637_v18 = vld [vmem:[%s5809_s13 + $0x8e] sm:$0xff]  ;;  %v3638_v28 = vld [vmem:[%s5809_s13 + $0x96] sm:$0xff] }
 0x126   : > { %v6606_v10 = vadd.f32 %v5205_v22, %v961_v30  ;;  %v956_v40 = vadd.f32 %v955_v32, %v6365_v42 }
 0x127   : > { %v5152_v43 = vpop.f32.mrf.mxu1  ;;  %v5208_v39 = vpop.f32.mrf.mxu0  ;;  %5469 = vmatmul.mubr.msk.f32.gmra.mxu1 %vm330_vm1, %v3203_v7  ;;  %5525 = vmatmul.mubr.msk.f32.gmra.mxu0 %vm330_vm1, %v3633_v63 }
 0x128   : > { %v6611_v48 = vadd.f32 %v1349_v25, %v956_v40  ;;  %v971_v49 = vadd.f32 %v5152_v43, %v6370_v45  ;;  %5471 = vmatprep.mubr.msk.f32.mxu1 %vm330_vm1, %v3204_v34  ;;  %5527 = vmatprep.mubr.msk.f32.mxu0 %vm330_vm1, %v3634_v36  ;;  %v3209_v25 = vld [vmem:[%s5809_s13 + $0x9d] sm:$0xff]  ;;  %v3210_v40 = vld [vmem:[%s5809_s13 + $0xa5] sm:$0xff] }
 0x129   : > { %v965_v41 = vpop.f32.mrf.mxu1  ;;  %v1359_v42 = vpop.f32.mrf.mxu0  ;;  %v3639_v34 = vld [vmem:[%s5809_s13 + $0x9e] sm:$0xff]  ;;  %v3640_v43 = vld [vmem:[%s5809_s13 + $0xa6] sm:$0xff] }
 0x12a   : > { %v6620_v16 = vadd.f32 %v5208_v39, %v971_v49  ;;  %v966_v6 = vadd.f32 %v965_v41, %v6379_v53 }
 0x12b   : > { %v5155_v62 = vpop.f32.mrf.mxu1  ;;  %v5211_v45 = vpop.f32.mrf.mxu0  ;;  %5472 = vmatmul.mubr.msk.f32.gmra.mxu1 %vm330_vm1, %v3205_v13  ;;  %5528 = vmatmul.mubr.msk.f32.gmra.mxu0 %vm330_vm1, %v3635_v61 }
 0x12c   : > { %v6625_v9 = vadd.f32 %v1359_v42, %v966_v6  ;;  %v981_v12 = vadd.f32 %v5155_v62, %v6384_v59  ;;  %5474 = vmatprep.mubr.msk.f32.mxu1 %vm330_vm1, %v3206_v54  ;;  %5530 = vmatprep.mubr.msk.f32.mxu0 %vm330_vm1, %v3636_v60  ;;  %v3211_v42 = vld [vmem:[%s5809_s13 + $0xad] sm:$0xff]  ;;  %v3212_v6 = vld [vmem:[%s5809_s13 + $0xb5] sm:$0xff] }
 0x12d   : > { %v975_v21 = vpop.f32.mrf.mxu1  ;;  %v1369_v53 = vpop.f32.mrf.mxu0  ;;  %v3641_v54 = vld [vmem:[%s5809_s13 + $0xae] sm:$0xff]  ;;  %v3642_v62 = vld [vmem:[%s5809_s13 + $0xb6] sm:$0xff] }
 0x12e   : > { %v6634_v22 = vadd.f32 %v5211_v45, %v981_v12  ;;  %v976_v30 = vadd.f32 %v975_v21, %v6393_v1 }
 0x12f   : > { %v5158_v7 = vpop.f32.mrf.mxu1  ;;  %v5214_v59 = vpop.f32.mrf.mxu0  ;;  %5475 = vmatmul.mubr.msk.f32.gmra.mxu1 %vm330_vm1, %v3207_v19  ;;  %5531 = vmatmul.mubr.msk.f32.gmra.mxu0 %vm330_vm1, %v3637_v18 }
 0x130   : > { %v6639_v63 = vadd.f32 %v1369_v53, %v976_v30  ;;  %v991_v32 = vadd.f32 %v5158_v7, %v6398_v3  ;;  %5477 = vmatprep.mubr.msk.f32.mxu1 %vm330_vm1, %v3208_v27  ;;  %5533 = vmatprep.mubr.msk.f32.mxu0 %vm330_vm1, %v3638_v28  ;;  %v3213_v53 = vld [vmem:[%s5809_s13 + $0xbd] sm:$0xff]  ;;  %v3214_v30 = vld [vmem:[%s5809_s13 + $0xc5] sm:$0xff] }
 0x131   : > { %v985_v36 = vpop.f32.mrf.mxu1  ;;  %v1379_v1 = vpop.f32.mrf.mxu0  ;;  %v3643_v27 = vld [vmem:[%s5809_s13 + $0xbe] sm:$0xff]  ;;  %v3644_v7 = vld [vmem:[%s5809_s13 + $0xc6] sm:$0xff] }
 0x132   : > { %v6648_v39 = vadd.f32 %v5214_v59, %v991_v32  ;;  %v986_v49 = vadd.f32 %v985_v36, %v6407_v52 }
 0x133   : > { %v5161_v13 = vpop.f32.mrf.mxu1  ;;  %v5217_v3 = vpop.f32.mrf.mxu0  ;;  %5478 = vmatmul.mubr.msk.f32.gmra.mxu1 %vm330_vm1, %v3209_v25  ;;  %5534 = vmatmul.mubr.msk.f32.gmra.mxu0 %vm330_vm1, %v3639_v34 }
 0x134   : > { %v6653_v61 = vadd.f32 %v1379_v1, %v986_v49  ;;  %v1001_v41 = vadd.f32 %v5161_v13, %v6412_v58  ;;  %5480 = vmatprep.mubr.msk.f32.mxu1 %vm330_vm1, %v3210_v40  ;;  %5536 = vmatprep.mubr.msk.f32.mxu0 %vm330_vm1, %v3640_v43  ;;  %v3215_v1 = vld [vmem:[%s5809_s13 + $0xcd] sm:$0xff]  ;;  %v3216_v49 = vld [vmem:[%s5809_s13 + $0xd5] sm:$0xff] }
 0x135   : > { %v995_v60 = vpop.f32.mrf.mxu1  ;;  %v1389_v52 = vpop.f32.mrf.mxu0  ;;  %v3645_v40 = vld [vmem:[%s5809_s13 + $0xce] sm:$0xff]  ;;  %v3646_v13 = vld [vmem:[%s5809_s13 + $0xd6] sm:$0xff] }
 0x136   : > { %v6662_v45 = vadd.f32 %v5217_v3, %v1001_v41  ;;  %v996_v12 = vadd.f32 %v995_v60, %v6421_v0 }
 0x137   : > { %v5164_v19 = vpop.f32.mrf.mxu1  ;;  %v5220_v58 = vpop.f32.mrf.mxu0  ;;  %5481 = vmatmul.mubr.msk.f32.gmra.mxu1 %vm330_vm1, %v3211_v42  ;;  %5537 = vmatmul.mubr.msk.f32.gmra.mxu0 %vm330_vm1, %v3641_v54 }
 0x138   : > { %v6667_v18 = vadd.f32 %v1389_v52, %v996_v12  ;;  %v1011_v21 = vadd.f32 %v5164_v19, %v6426_v5  ;;  %5483 = vmatprep.mubr.msk.f32.mxu1 %vm330_vm1, %v3212_v6  ;;  %5539 = vmatprep.mubr.msk.f32.mxu0 %vm330_vm1, %v3642_v62  ;;  %v3217_v52 = vld [vmem:[%s5809_s13 + $0xdd] sm:$0xff]  ;;  %v3218_v12 = vld [vmem:[%s5809_s13 + $0xe5] sm:$0xff] }
 0x139   : > { %v1005_v28 = vpop.f32.mrf.mxu1  ;;  %v1399_v0 = vpop.f32.mrf.mxu0  ;;  %v3647_v6 = vld [vmem:[%s5809_s13 + $0xde] sm:$0xff]  ;;  %v3648_v19 = vld [vmem:[%s5809_s13 + $0xe6] sm:$0xff] }
 0x13a   : > { %v6676_v59 = vadd.f32 %v5220_v58, %v1011_v21  ;;  %v1006_v32 = vadd.f32 %v1005_v28, %v6435_v8 }
 0x13b   : > { %v5167_v25 = vpop.f32.mrf.mxu1  ;;  %v5223_v5 = vpop.f32.mrf.mxu0  ;;  %5484 = vmatmul.mubr.msk.f32.gmra.mxu1 %vm330_vm1, %v3213_v53  ;;  %5540 = vmatmul.mubr.msk.f32.gmra.mxu0 %vm330_vm1, %v3643_v27 }
 0x13c   : > { %v6681_v34 = vadd.f32 %v1399_v0, %v1006_v32  ;;  %v1021_v36 = vadd.f32 %v5167_v25, %v6440_v11  ;;  %5486 = vmatprep.mubr.msk.f32.mxu1 %vm330_vm1, %v3214_v30  ;;  %5542 = vmatprep.mubr.msk.f32.mxu0 %vm330_vm1, %v3644_v7  ;;  %v3219_v0 = vld [vmem:[%s5809_s13 + $0xed] sm:$0xff]  ;;  %v3220_v32 = vld [vmem:[%s5809_s13 + $0xf5] sm:$0xff] }
 0x13d   : > { %v1015_v43 = vpop.f32.mrf.mxu1  ;;  %v1409_v8 = vpop.f32.mrf.mxu0  ;;  %v3649_v30 = vld [vmem:[%s5809_s13 + $0xee] sm:$0xff]  ;;  %v3650_v25 = vld [vmem:[%s5809_s13 + $0xf6] sm:$0xff] }
 0x13e   : > { %v6690_v3 = vadd.f32 %v5223_v5, %v1021_v36  ;;  %v1016_v41 = vadd.f32 %v1015_v43, %v6449_v14 }
 0x13f   : > { %v5170_v42 = vpop.f32.mrf.mxu1  ;;  %v5226_v11 = vpop.f32.mrf.mxu0  ;;  %5487 = vmatmul.mubr.msk.f32.gmra.mxu1 %vm330_vm1, %v3215_v1  ;;  %5543 = vmatmul.mubr.msk.f32.gmra.mxu0 %vm330_vm1, %v3645_v40 }
 0x140   : > { %v6695_v54 = vadd.f32 %v1409_v8, %v1016_v41  ;;  %v1031_v60 = vadd.f32 %v5170_v42, %v6454_v17  ;;  %5489 = vmatprep.mubr.msk.f32.mxu1 %vm330_vm1, %v3216_v49  ;;  %5545 = vmatprep.mubr.msk.f32.mxu0 %vm330_vm1, %v3646_v13  ;;  %v3221_v8 = vld [vmem:[%s5809_s13 + $0xfd] sm:$0xff]  ;;  %v3222_v41 = vld [vmem:[%s5809_s13 + $0x105] sm:$0xff] }
 0x141   : > { %v1025_v62 = vpop.f32.mrf.mxu1  ;;  %v1419_v14 = vpop.f32.mrf.mxu0  ;;  %v3651_v49 = vld [vmem:[%s5809_s13 + $0xfe] sm:$0xff]  ;;  %v3652_v42 = vld [vmem:[%s5809_s13 + $0x106] sm:$0xff] }
 0x142   : > { %v6704_v58 = vadd.f32 %v5226_v11, %v1031_v60  ;;  %v1026_v21 = vadd.f32 %v1025_v62, %v6463_v20 }
 0x143   : > { %v5173_v53 = vpop.f32.mrf.mxu1  ;;  %v5229_v17 = vpop.f32.mrf.mxu0  ;;  %5490 = vmatmul.mubr.msk.f32.gmra.mxu1 %vm330_vm1, %v3217_v52  ;;  %5546 = vmatmul.mubr.msk.f32.gmra.mxu0 %vm330_vm1, %v3647_v6 }
 0x144   : > { %v6709_v27 = vadd.f32 %v1419_v14, %v1026_v21  ;;  %v1041_v28 = vadd.f32 %v5173_v53, %v6468_v23  ;;  %5492 = vmatprep.mubr.msk.f32.mxu1 %vm330_vm1, %v3218_v12  ;;  %5548 = vmatprep.mubr.msk.f32.mxu0 %vm330_vm1, %v3648_v19  ;;  %v3223_v14 = vld [vmem:[%s5809_s13 + $0x10d] sm:$0xff]  ;;  %v3224_v21 = vld [vmem:[%s5809_s13 + $0x115] sm:$0xff] }
 0x145   : > { %v1035_v7 = vpop.f32.mrf.mxu1  ;;  %v1429_v20 = vpop.f32.mrf.mxu0  ;;  %v3653_v12 = vld [vmem:[%s5809_s13 + $0x10e] sm:$0xff]  ;;  %v3654_v53 = vld [vmem:[%s5809_s13 + $0x116] sm:$0xff] }
 0x146   : > { %v6718_v5 = vadd.f32 %v5229_v17, %v1041_v28  ;;  %v1036_v36 = vadd.f32 %v1035_v7, %v6477_v26 }
 0x147   : > { %v5234_v1 = vpop.f32.mrf.mxu1  ;;  %v5290_v23 = vpop.f32.mrf.mxu0  ;;  %5493 = vmatmul.mubr.msk.f32.gmra.mxu1 %vm330_vm1, %v3219_v0  ;;  %5549 = vmatmul.mubr.msk.f32.gmra.mxu0 %vm330_vm1, %v3649_v30 }
 0x148   : > { %v6723_v40 = vadd.f32 %v1429_v20, %v1036_v36  ;;  %v1869_v43 = vadd.f32 %v5234_v1, %v6487_v35  ;;  %5495 = vmatprep.mubr.msk.f32.mxu1 %vm330_vm1, %v3220_v32  ;;  %5551 = vmatprep.mubr.msk.f32.mxu0 %vm330_vm1, %v3650_v25  ;;  %v3225_v20 = vld [vmem:[%s5809_s13 + $0x11d] sm:$0xff]  ;;  %v3226_v36 = vld [vmem:[%s5809_s13 + $0x125] sm:$0xff] }
 0x149   : > { %v1689_v13 = vpop.f32.mrf.mxu1  ;;  %v2119_v26 = vpop.f32.mrf.mxu0  ;;  %v3655_v32 = vld [vmem:[%s5809_s13 + $0x11e] sm:$0xff]  ;;  %v3656_v1 = vld [vmem:[%s5809_s13 + $0x126] sm:$0xff] }
 0x14a   : > { %v6732_v11 = vadd.f32 %v5290_v23, %v1869_v43  ;;  %v1868_v60 = vadd.f32 %v1689_v13, %v6492_v38 }
 0x14b   : > { %v5237_v52 = vpop.f32.mrf.mxu1  ;;  %v5293_v35 = vpop.f32.mrf.mxu0  ;;  %5496 = vmatmul.mubr.msk.f32.gmra.mxu1 %vm330_vm1, %v3221_v8  ;;  %5552 = vmatmul.mubr.msk.f32.gmra.mxu0 %vm330_vm1, %v3651_v49 }
 0x14c   : > { %v6737_v6 = vadd.f32 %v2119_v26, %v1868_v60  ;;  %v1871_v62 = vadd.f32 %v5237_v52, %v6499_v46  ;;  %5498 = vmatprep.mubr.msk.f32.mxu1 %vm330_vm1, %v3222_v41  ;;  %5554 = vmatprep.mubr.msk.f32.mxu0 %vm330_vm1, %v3652_v42  ;;  %v3227_v26 = vld [vmem:[%s5809_s13 + $0x12d] sm:$0xff]  ;;  %v3228_v60 = vld [vmem:[%s5809_s13 + $0x135] sm:$0xff] }
 0x14d   : > { %v1699_v19 = vpop.f32.mrf.mxu1  ;;  %v2129_v38 = vpop.f32.mrf.mxu0  ;;  %v3657_v41 = vld [vmem:[%s5809_s13 + $0x12e] sm:$0xff]  ;;  %v3658_v52 = vld [vmem:[%s5809_s13 + $0x136] sm:$0xff] }
 0x14e   : > { %v6746_v17 = vadd.f32 %v5293_v35, %v1871_v62  ;;  %v1870_v28 = vadd.f32 %v1699_v19, %v6504_v44 }
 0x14f   : > { %v5240_v0 = vpop.f32.mrf.mxu1  ;;  %v5296_v46 = vpop.f32.mrf.mxu0  ;;  %5499 = vmatmul.mubr.msk.f32.gmra.mxu1 %vm330_vm1, %v3223_v14  ;;  %5555 = vmatmul.mubr.msk.f32.gmra.mxu0 %vm330_vm1, %v3653_v12 }
 0x150   : > { %v6751_v30 = vadd.f32 %v2129_v38, %v1870_v28  ;;  %v1873_v7 = vadd.f32 %v5240_v0, %v6511_v15  ;;  %5501 = vmatprep.mubr.msk.f32.mxu1 %vm330_vm1, %v3224_v21  ;;  %5557 = vmatprep.mubr.msk.f32.mxu0 %vm330_vm1, %v3654_v53  ;;  %v3229_v38 = vld [vmem:[%s5809_s13 + $0x13d] sm:$0xff] }
 0x151   : > { %v1709_v25 = vpop.f32.mrf.mxu1  ;;  %v2139_v44 = vpop.f32.mrf.mxu0  ;;  %v3659_v21 = vld [vmem:[%s5809_s13 + $0x13e] sm:$0xff]  ;;  %s5568_s13 = smul.u32 288, %s237_s10 }
 0x152   : > { %v6760_v23 = vadd.f32 %v5296_v46, %v1873_v7  ;;  %v1872_v43 = vadd.f32 %v1709_v25, %v6516_v57 }
 0x153   : > { %v5243_v8 = vpop.f32.mrf.mxu1  ;;  %v5299_v15 = vpop.f32.mrf.mxu0  ;;  %5502 = vmatmul.mubr.msk.f32.gmra.mxu1 %vm330_vm1, %v3225_v20  ;;  %5558 = vmatmul.mubr.msk.f32.gmra.mxu0 %vm330_vm1, %v3655_v32  ;;  %s7001_s22 = scalar_lea.vmem [#allocation2], %s5568_s13 }
 0x154   : > { %v6765_v49 = vadd.f32 %v2139_v44, %v1872_v43  ;;  %v1875_v13 = vadd.f32 %v5243_v8, %v6523_v31  ;;  %5504 = vmatprep.mubr.msk.f32.mxu1 %vm330_vm1, %v3226_v36  ;;  %5560 = vmatprep.mubr.msk.f32.mxu0 %vm330_vm1, %v3656_v1  ;;  %s4263_s26 = sshll.u32 %s7001_s22, 4  ;;  %s7143_s26 = int_to_ptr.vmem [resolvable:$true] %s4263_s26 }
 0x155   : > { %v1719_v42 = vpop.f32.mrf.mxu1  ;;  %v2149_v57 = vpop.f32.mrf.mxu0  ;;  %s5628_s6 = scalar_lea.vmem %s7143_s26, 4608  ;;  %p5635_p1 = scmp.lt.s32.totalorder %s7143_s26, %s5633_s8 }
 0x156   : > { %v6774_v35 = vadd.f32 %v5299_v15, %v1875_v13  ;;  %v1874_v62 = vadd.f32 %v1719_v42, %v6528_v50  ;;  %p5629_p12 = scmp.ne.s32.totalorder %s7143_s26, %s5628_s6  ;;  %p5636_p2 = scmp.lt.s32.totalorder %s5634_s9, %s5628_s6 }
 0x157   : > { %v5246_v14 = vpop.f32.mrf.mxu1  ;;  %v5302_v12 = vpop.f32.mrf.mxu0  ;;  %5505 = vmatmul.mubr.msk.f32.gmra.mxu1 %vm330_vm1, %v3227_v26  ;;  %5561 = vmatmul.mubr.msk.f32.gmra.mxu0 %vm330_vm1, %v3657_v41 }
 0x158   : > { %v6779_v31 = vadd.f32 %v2149_v57, %v1874_v62  ;;  %v1877_v19 = vadd.f32 %v5246_v14, %v6536_v55  ;;  %5507 = vmatprep.mubr.msk.f32.mxu1 %vm330_vm1, %v3228_v60  ;;  %5563 = vmatprep.mubr.msk.f32.mxu0 %vm330_vm1, %v3658_v52  ;;  %p5630_p13 = pnand %p5629_p12, %p5774_p4  ;;  %p5637_p3 = por %p5636_p2, %p5635_p1 }
 0x159   : > { %v1729_v53 = vpop.f32.mrf.mxu1  ;;  %v2159_v28 = vpop.f32.mrf.mxu0 }
 0x15a   : > { %v6786_v0 = vadd.f32 %v5302_v12, %v1877_v19  ;;  %v1876_v50 = vadd.f32 %v1729_v53, %v6541_v56  ;;  %p5631_p0 = pneg %p5630_p13 }
 0x15b   : > { %v5249_v46 = vpop.f32.mrf.mxu1  ;;  %v5305_v7 = vpop.f32.mrf.mxu0  ;;  %5508 = vmatmul.mubr.msk.f32.gmra.mxu1 %vm330_vm1, %v3229_v38  ;;  %5564 = vmatmul.mubr.msk.f32.gmra.mxu0 %vm330_vm1, %v3659_v21 }
 0x15c   : > { %v6791_v20 = vadd.f32 %v2159_v28, %v1876_v50  ;;  %v1879_v55 = vadd.f32 %v5249_v46, %v6550_v51  ;;  %p5638_p5 = pnand %p5637_p3, %p5631_p0 }
 0x15d   : > { %v1739_v32 = vpop.f32.mrf.mxu1  ;;  %v2169_v25 = vpop.f32.mrf.mxu0 }
 0x15e   : > { %v6794_v44 = vadd.f32 %v5305_v7, %v1879_v55  ;;  %v1878_v36 = vadd.f32 %v1739_v32, %v6555_v24 }
 0x15f   : > { %v5252_v1 = vpop.f32.mrf.mxu1  ;;  %v5308_v43 = vpop.f32.mrf.mxu0 }
 0x160   : > { %v6797_v8 = vadd.f32 %v2169_v25, %v1878_v36  ;;  %v1881_v56 = vadd.f32 %v5252_v1, %v6564_v33 }
 0x161   : > { %v1749_v15 = vpop.f32.mrf.mxu1  ;;  %v2179_v13 = vpop.f32.mrf.mxu0 }
 0x162   : > { %v6800_v26 = vadd.f32 %v5308_v43, %v1881_v56  ;;  %v1880_v41 = vadd.f32 %v1749_v15, %v6569_v37 }
 0x163   : > { %v5255_v42 = vpop.f32.mrf.mxu1  ;;  %v5311_v51 = vpop.f32.mrf.mxu0 }
 0x164   : > { %v6803_v57 = vadd.f32 %v2179_v13, %v1880_v41  ;;  %v1883_v60 = vadd.f32 %v5255_v42, %v6578_v47 }
 0x165   : > { %v1759_v52 = vpop.f32.mrf.mxu1  ;;  %v2189_v24 = vpop.f32.mrf.mxu0 }
 0x166   : > { %v6806_v62 = vadd.f32 %v5311_v51, %v1883_v60  ;;  %v1882_v14 = vadd.f32 %v1759_v52, %v6583_v2 }
 0x167   : > { %v5258_v12 = vpop.f32.mrf.mxu1  ;;  %v5314_v33 = vpop.f32.mrf.mxu0 }
 0x168   : > { %v6809_v19 = vadd.f32 %v2189_v24, %v1882_v14  ;;  %v1885_v38 = vadd.f32 %v5258_v12, %v6592_v4 }
 0x169   : > { %v1769_v21 = vpop.f32.mrf.mxu1  ;;  %v2199_v37 = vpop.f32.mrf.mxu0 }
 0x16a   : > { %v6812_v53 = vadd.f32 %v5314_v33, %v1885_v38  ;;  %v1884_v28 = vadd.f32 %v1769_v21, %v6597_v29 }
 0x16b   : > { %v5261_v50 = vpop.f32.mrf.mxu1  ;;  %v5317_v47 = vpop.f32.mrf.mxu0 }
 0x16c   : > { %v6815_v46 = vadd.f32 %v2199_v37, %v1884_v28  ;;  %v1887_v7 = vadd.f32 %v5261_v50, %v6606_v10 }
 0x16d   : > { %v1779_v55 = vpop.f32.mrf.mxu1  ;;  %v2209_v2 = vpop.f32.mrf.mxu0 }
 0x16e   : > { %v6818_v32 = vadd.f32 %v5317_v47, %v1887_v7  ;;  %v1886_v25 = vadd.f32 %v1779_v55, %v6611_v48 }
 0x16f   : > { %v5264_v36 = vpop.f32.mrf.mxu1  ;;  %v5320_v4 = vpop.f32.mrf.mxu0 }
 0x170   : > { %v6821_v1 = vadd.f32 %v2209_v2, %v1886_v25  ;;  %v1889_v43 = vadd.f32 %v5264_v36, %v6620_v16 }
 0x171   : > { %v1789_v56 = vpop.f32.mrf.mxu1  ;;  %v2219_v29 = vpop.f32.mrf.mxu0 }
 0x172   : > { %v6824_v15 = vadd.f32 %v5320_v4, %v1889_v43  ;;  %v1888_v13 = vadd.f32 %v1789_v56, %v6625_v9 }
 0x173   : > { %v5267_v41 = vpop.f32.mrf.mxu1  ;;  %v5323_v10 = vpop.f32.mrf.mxu0 }
 0x174   : > { %v6827_v42 = vadd.f32 %v2219_v29, %v1888_v13  ;;  %v1891_v51 = vadd.f32 %v5267_v41, %v6634_v22 }
 0x175   : > { %v1799_v60 = vpop.f32.mrf.mxu1  ;;  %v2229_v48 = vpop.f32.mrf.mxu0 }
 0x176   : > { %v6830_v52 = vadd.f32 %v5323_v10, %v1891_v51  ;;  %v1890_v24 = vadd.f32 %v1799_v60, %v6639_v63 }
 0x177   : > { %v5270_v14 = vpop.f32.mrf.mxu1  ;;  %v5326_v16 = vpop.f32.mrf.mxu0 }
 0x178   : > { %v6833_v12 = vadd.f32 %v2229_v48, %v1890_v24  ;;  %v1893_v33 = vadd.f32 %v5270_v14, %v6648_v39 }
 0x179   : > { %v1809_v38 = vpop.f32.mrf.mxu1  ;;  %v2239_v9 = vpop.f32.mrf.mxu0 }
 0x17a   : > { %v6836_v21 = vadd.f32 %v5326_v16, %v1893_v33  ;;  %v1892_v37 = vadd.f32 %v1809_v38, %v6653_v61 }
 0x17b   : > { %v5273_v28 = vpop.f32.mrf.mxu1  ;;  %v5329_v22 = vpop.f32.mrf.mxu0 }
 0x17c   : > { %v6839_v50 = vadd.f32 %v2239_v9, %v1892_v37  ;;  %v1895_v47 = vadd.f32 %v5273_v28, %v6662_v45 }
 0x17d   : > { %v1819_v7 = vpop.f32.mrf.mxu1  ;;  %v2249_v63 = vpop.f32.mrf.mxu0 }
 0x17e   : > { %v6842_v55 = vadd.f32 %v5329_v22, %v1895_v47  ;;  %v1894_v2 = vadd.f32 %v1819_v7, %v6667_v18 }
 0x17f   : > { %v5276_v25 = vpop.f32.mrf.mxu1  ;;  %v5332_v39 = vpop.f32.mrf.mxu0 }
 0x180   : > { %v6845_v36 = vadd.f32 %v2249_v63, %v1894_v2  ;;  %v1897_v4 = vadd.f32 %v5276_v25, %v6676_v59 }
 0x181   : > { %v1829_v43 = vpop.f32.mrf.mxu1  ;;  %v2259_v61 = vpop.f32.mrf.mxu0 }
 0x182   : > { %v6848_v56 = vadd.f32 %v5332_v39, %v1897_v4  ;;  %v1896_v29 = vadd.f32 %v1829_v43, %v6681_v34 }
 0x183   : > { %v5279_v13 = vpop.f32.mrf.mxu1  ;;  %v5335_v45 = vpop.f32.mrf.mxu0 }
 0x184   : > { %v6851_v41 = vadd.f32 %v2259_v61, %v1896_v29  ;;  %v1899_v10 = vadd.f32 %v5279_v13, %v6690_v3 }
 0x185   : > { %v1839_v51 = vpop.f32.mrf.mxu1  ;;  %v2269_v18 = vpop.f32.mrf.mxu0 }
 0x186   : > { %v6854_v60 = vadd.f32 %v5335_v45, %v1899_v10  ;;  %v1898_v48 = vadd.f32 %v1839_v51, %v6695_v54 }
 0x187   : > { %v5282_v24 = vpop.f32.mrf.mxu1  ;;  %v5338_v59 = vpop.f32.mrf.mxu0 }
 0x188   : > { %v6857_v14 = vadd.f32 %v2269_v18, %v1898_v48  ;;  %v1901_v16 = vadd.f32 %v5282_v24, %v6704_v58 }
 0x189   : > { %v1849_v33 = vpop.f32.mrf.mxu1  ;;  %v2279_v34 = vpop.f32.mrf.mxu0 }
 0x18a   : > { %v6860_v38 = vadd.f32 %v5338_v59, %v1901_v16  ;;  %v1900_v9 = vadd.f32 %v1849_v33, %v6709_v27 }
 0x18b   : > { %v5285_v37 = vpop.f32.mrf.mxu1  ;;  %v5341_v3 = vpop.f32.mrf.mxu0 }
 0x18c   : > { %v6863_v28 = vadd.f32 %v2279_v34, %v1900_v9  ;;  %v1903_v22 = vadd.f32 %v5285_v37, %v6718_v5 }
 0x18d   : > { %v1859_v47 = vpop.f32.mrf.mxu1  ;;  %v2289_v54 = vpop.f32.mrf.mxu0 }
 0x18e   : > { %v6866_v7 = vadd.f32 %v5341_v3, %v1903_v22  ;;  %v1902_v63 = vadd.f32 %v1859_v47, %v6723_v40 }
 0x18f   : > { %v5346_v2 = vpop.f32.mrf.mxu1  ;;  %v5402_v58 = vpop.f32.mrf.mxu0 }
 0x190   : > { %v6869_v25 = vadd.f32 %v2289_v54, %v1902_v63  ;;  %v2729_v39 = vadd.f32 %v5346_v2, %v6732_v11 }
 0x191   : > { %v2549_v4 = vpop.f32.mrf.mxu1  ;;  %v2979_v27 = vpop.f32.mrf.mxu0 }
 0x192   : > { %v6872_v43 = vadd.f32 %v5402_v58, %v2729_v39  ;;  %v2728_v61 = vadd.f32 %v2549_v4, %v6737_v6 }
 0x193   : > { %v5349_v29 = vpop.f32.mrf.mxu1  ;;  %v5405_v5 = vpop.f32.mrf.mxu0 }
 0x194   : > { %v6875_v13 = vadd.f32 %v2979_v27, %v2728_v61  ;;  %v2731_v45 = vadd.f32 %v5349_v29, %v6746_v17 }
 0x195   : > { %v2559_v10 = vpop.f32.mrf.mxu1  ;;  %v2989_v40 = vpop.f32.mrf.mxu0 }
 0x196   : > { %v6878_v51 = vadd.f32 %v5405_v5, %v2731_v45  ;;  %v2730_v18 = vadd.f32 %v2559_v10, %v6751_v30 }
 0x197   : > { %v5352_v48 = vpop.f32.mrf.mxu1  ;;  %v5408_v11 = vpop.f32.mrf.mxu0 }
 0x198   : > { %v6881_v24 = vadd.f32 %v2989_v40, %v2730_v18  ;;  %v2733_v59 = vadd.f32 %v5352_v48, %v6760_v23 }
 0x199   : > { %v2569_v16 = vpop.f32.mrf.mxu1  ;;  %v2999_v6 = vpop.f32.mrf.mxu0 }
 0x19a   : > { %v6884_v33 = vadd.f32 %v5408_v11, %v2733_v59  ;;  %v2732_v34 = vadd.f32 %v2569_v16, %v6765_v49 }
 0x19b   : > { %v5355_v9 = vpop.f32.mrf.mxu1  ;;  %v5411_v17 = vpop.f32.mrf.mxu0 }
 0x19c   : > { %v6887_v37 = vadd.f32 %v2999_v6, %v2732_v34  ;;  %v2735_v3 = vadd.f32 %v5355_v9, %v6774_v35 }
 0x19d   : > { %v2579_v22 = vpop.f32.mrf.mxu1  ;;  %v3009_v30 = vpop.f32.mrf.mxu0 }
 0x19e   : > { %v6890_v47 = vadd.f32 %v5411_v17, %v2735_v3  ;;  %v2734_v54 = vadd.f32 %v2579_v22, %v6779_v31 }
 0x19f   : > { %v5358_v63 = vpop.f32.mrf.mxu1  ;;  %v5414_v23 = vpop.f32.mrf.mxu0 }
 0x1a0   : > { %v6893_v2 = vadd.f32 %v3009_v30, %v2734_v54  ;;  %v2737_v58 = vadd.f32 %v5358_v63, %v6786_v0 }
 0x1a1   : > { %v2589_v39 = vpop.f32.mrf.mxu1  ;;  %v3019_v49 = vpop.f32.mrf.mxu0 }
 0x1a2   : > { %v6896_v4 = vadd.f32 %v5414_v23, %v2737_v58  ;;  %v2736_v27 = vadd.f32 %v2589_v39, %v6791_v20 }
 0x1a3   : > { %v5361_v61 = vpop.f32.mrf.mxu1  ;;  %v5417_v35 = vpop.f32.mrf.mxu0 }
 0x1a4   : > { %v6899_v29 = vadd.f32 %v3019_v49, %v2736_v27  ;;  %v2739_v5 = vadd.f32 %v5361_v61, %v6794_v44 }
 0x1a5   : > { %v2599_v45 = vpop.f32.mrf.mxu1  ;;  %v3029_v31 = vpop.f32.mrf.mxu0 }
 0x1a6   : > { %v6902_v10 = vadd.f32 %v5417_v35, %v2739_v5  ;;  %v2738_v40 = vadd.f32 %v2599_v45, %v6797_v8 }
 0x1a7   : > { %v5364_v18 = vpop.f32.mrf.mxu1  ;;  %v5420_v0 = vpop.f32.mrf.mxu0 }
 0x1a8   : > { %v6905_v48 = vadd.f32 %v3029_v31, %v2738_v40  ;;  %v2741_v11 = vadd.f32 %v5364_v18, %v6800_v26 }
 0x1a9   : > { %v2609_v59 = vpop.f32.mrf.mxu1  ;;  %v3039_v20 = vpop.f32.mrf.mxu0 }
 0x1aa   : > { %v6908_v16 = vadd.f32 %v5420_v0, %v2741_v11  ;;  %v2740_v6 = vadd.f32 %v2609_v59, %v6803_v57 }
 0x1ab   : > { %v5367_v34 = vpop.f32.mrf.mxu1  ;;  %v5423_v44 = vpop.f32.mrf.mxu0 }
 0x1ac   : > { %v6911_v9 = vadd.f32 %v3039_v20, %v2740_v6  ;;  %v2743_v17 = vadd.f32 %v5367_v34, %v6806_v62 }
 0x1ad   : > { %v2619_v3 = vpop.f32.mrf.mxu1  ;;  %v3049_v8 = vpop.f32.mrf.mxu0 }
 0x1ae   : > { %v6914_v22 = vadd.f32 %v5423_v44, %v2743_v17  ;;  %v2742_v30 = vadd.f32 %v2619_v3, %v6809_v19 }
 0x1af   : > { %v5370_v54 = vpop.f32.mrf.mxu1  ;;  %v5426_v26 = vpop.f32.mrf.mxu0 }
 0x1b0   : > { %v6917_v63 = vadd.f32 %v3049_v8, %v2742_v30  ;;  %v2745_v23 = vadd.f32 %v5370_v54, %v6812_v53 }
 0x1b1   : > { %v2629_v58 = vpop.f32.mrf.mxu1  ;;  %v3059_v57 = vpop.f32.mrf.mxu0 }
 0x1b2   : > { %v6920_v39 = vadd.f32 %v5426_v26, %v2745_v23  ;;  %v2744_v49 = vadd.f32 %v2629_v58, %v6815_v46 }
 0x1b3   : > { %v5373_v27 = vpop.f32.mrf.mxu1  ;;  %v5429_v62 = vpop.f32.mrf.mxu0 }
 0x1b4   : > { %v6923_v61 = vadd.f32 %v3059_v57, %v2744_v49  ;;  %v2747_v35 = vadd.f32 %v5373_v27, %v6818_v32 }
 0x1b5   : > { %v2639_v5 = vpop.f32.mrf.mxu1  ;;  %v3069_v19 = vpop.f32.mrf.mxu0 }
 0x1b6   : > { %v6926_v45 = vadd.f32 %v5429_v62, %v2747_v35  ;;  %v2746_v31 = vadd.f32 %v2639_v5, %v6821_v1 }
 0x1b7   : > { %v5376_v40 = vpop.f32.mrf.mxu1  ;;  %v5432_v53 = vpop.f32.mrf.mxu0 }
 0x1b8   : > { %v6929_v18 = vadd.f32 %v3069_v19, %v2746_v31  ;;  %v2749_v0 = vadd.f32 %v5376_v40, %v6824_v15 }
 0x1b9   : > { %v2649_v11 = vpop.f32.mrf.mxu1  ;;  %v3079_v46 = vpop.f32.mrf.mxu0 }
 0x1ba   : > { %v6932_v59 = vadd.f32 %v5432_v53, %v2749_v0  ;;  %v2748_v20 = vadd.f32 %v2649_v11, %v6827_v42 }
 0x1bb   : > { %v5379_v6 = vpop.f32.mrf.mxu1  ;;  %v5435_v32 = vpop.f32.mrf.mxu0 }
 0x1bc   : > { %v6935_v34 = vadd.f32 %v3079_v46, %v2748_v20  ;;  %v2751_v44 = vadd.f32 %v5379_v6, %v6830_v52 }
 0x1bd   : > { %v2659_v17 = vpop.f32.mrf.mxu1  ;;  %v3089_v1 = vpop.f32.mrf.mxu0 }
 0x1be   : > { %v6938_v3 = vadd.f32 %v5435_v32, %v2751_v44  ;;  %v2750_v8 = vadd.f32 %v2659_v17, %v6833_v12 }
 0x1bf   : > { %v5382_v30 = vpop.f32.mrf.mxu1  ;;  %v5438_v15 = vpop.f32.mrf.mxu0 }
 0x1c0   : > { %v6941_v54 = vadd.f32 %v3089_v1, %v2750_v8  ;;  %v2753_v26 = vadd.f32 %v5382_v30, %v6836_v21 }
 0x1c1   : > { %v2669_v23 = vpop.f32.mrf.mxu1  ;;  %v3099_v42 = vpop.f32.mrf.mxu0 }
 0x1c2   : > { %v6944_v58 = vadd.f32 %v5438_v15, %v2753_v26  ;;  %v2752_v57 = vadd.f32 %v2669_v23, %v6839_v50 }
 0x1c3   : > { %v5385_v49 = vpop.f32.mrf.mxu1  ;;  %v5441_v52 = vpop.f32.mrf.mxu0 }
 0x1c4   : > { %v6947_v27 = vadd.f32 %v3099_v42, %v2752_v57  ;;  %v2755_v62 = vadd.f32 %v5385_v49, %v6842_v55 }
 0x1c5   : > { %v2679_v35 = vpop.f32.mrf.mxu1  ;;  %v3109_v12 = vpop.f32.mrf.mxu0 }
 0x1c6   : > { %v6950_v5 = vadd.f32 %v5441_v52, %v2755_v62  ;;  %v2754_v19 = vadd.f32 %v2679_v35, %v6845_v36 }
 0x1c7   : > { %v5388_v31 = vpop.f32.mrf.mxu1  ;;  %v5444_v21 = vpop.f32.mrf.mxu0 }
 0x1c8   : > { %v6953_v40 = vadd.f32 %v3109_v12, %v2754_v19  ;;  %v2757_v53 = vadd.f32 %v5388_v31, %v6848_v56 }
 0x1c9   : > { %v2689_v0 = vpop.f32.mrf.mxu1  ;;  %v3119_v50 = vpop.f32.mrf.mxu0 }
 0x1ca   : > { %v6956_v11 = vadd.f32 %v5444_v21, %v2757_v53  ;;  %v2756_v46 = vadd.f32 %v2689_v0, %v6851_v41  ;;  %v6984_v21 = vld [vmem:[%s7196_s2] ss:$0 sm:$0xff] }
 0x1cb   : > { %v5391_v20 = vpop.f32.mrf.mxu1  ;;  %v5447_v55 = vpop.f32.mrf.mxu0 }
 0x1cc   : > { %v6959_v6 = vadd.f32 %v3119_v50, %v2756_v46  ;;  %v2759_v32 = vadd.f32 %v5391_v20, %v6854_v60 }
 0x1cd   : > { %v2699_v44 = vpop.f32.mrf.mxu1  ;;  %v3129_v36 = vpop.f32.mrf.mxu0 }
 0x1ce   : > { %v6962_v17 = vadd.f32 %v5447_v55, %v2759_v32  ;;  %v2758_v1 = vadd.f32 %v2699_v44, %v6857_v14 }
 0x1cf   : > { %v5394_v8 = vpop.f32.mrf.mxu1  ;;  %v5450_v56 = vpop.f32.mrf.mxu0 }
 0x1d0   : > { %v6965_v30 = vadd.f32 %v3129_v36, %v2758_v1  ;;  %v2761_v15 = vadd.f32 %v5394_v8, %v6860_v38 }
 0x1d1   : > { %v2709_v41 = vpop.f32.mrf.mxu1  ;;  %v3139_v26 = vpop.f32.mrf.mxu0 }
 0x1d2   : > { %v6968_v23 = vadd.f32 %v5450_v56, %v2761_v15  ;;  %v2760_v42 = vadd.f32 %v2709_v41, %v6863_v28 }
 0x1d3   : > { %v5397_v60 = vpop.f32.mrf.mxu1  ;;  %v5453_v57 = vpop.f32.mrf.mxu0 }
 0x1d4   : > { %v6971_v49 = vadd.f32 %v3139_v26, %v2760_v42  ;;  %v2763_v14 = vadd.f32 %v5397_v60, %v6866_v7 }
 0x1d5   : > { %v2719_v52 = vpop.f32.mrf.mxu1  ;;  %v3149_v62 = vpop.f32.mrf.mxu0 }
 0x1d6   : > { %v6974_v35 = vadd.f32 %v5453_v57, %v2763_v14  ;;  %v2762_v12 = vadd.f32 %v2719_v52, %v6869_v25  ;;  %v6992_v25 = vld [vmem:[%s7197_s3] ss:$0 sm:$0xff] }
 0x1d7   : > { %v5458_v38 = vpop.f32.mrf.mxu1  ;;  %v5514_v19 = vpop.f32.mrf.mxu0 }
 0x1d8   : > { %v6978_v31 = vadd.f32 %v3149_v62, %v2762_v12  ;;  %v3589_v28 = vadd.f32 %v5458_v38, %v6872_v43 }
 0x1d9   : > { %v3409_v53 = vpop.f32.mrf.mxu1  ;;  %v3839_v7 = vpop.f32.mrf.mxu0 }
 0x1da   : > { %v4019_v0 = vadd.f32 %v5514_v19, %v3589_v28  ;;  %v3588_v50 = vadd.f32 %v3409_v53, %v6875_v13 }
 0x1db   : > { %v5461_v46 = vpop.f32.mrf.mxu1  ;;  %v5517_v20 = vpop.f32.mrf.mxu0 }
 0x1dc   : > { %v4062_v43 = vadd.f32 %v6984_v21, %v4019_v0  ;;  %v4018_v55 = vadd.f32 %v3839_v7, %v3588_v50  ;;  %v3591_v32 = vadd.f32 %v5461_v46, %v6878_v51 }
 0x1dd   : > { %v3419_v44 = vpop.f32.mrf.mxu1  ;;  %v3849_v36 = vpop.f32.mrf.mxu0 }
 0x1de   : > { %vm4098_vm2 = vcmp.gt.f32.partialorder %v4062_v43, 0.0  ;;  %v4141_v1 = vmul.f32 %v6992_v25, %v4062_v43  ;;  %v4061_v8 = vadd.f32 %v6984_v21, %v4018_v55  ;;  %v4021_v13 = vadd.f32 %v5517_v20, %v3591_v32 }
 0x1df   : > { %v3590_v56 = vadd.f32 %v3419_v44, %v6881_v24  ;;  %v5464_v15 = vpop.f32.mrf.mxu1  ;;  %v5520_v41 = vpop.f32.mrf.mxu0 }
 0x1e0   : > { %v4177_v26 = vsel %vm4098_vm2, %v4062_v43, %v4141_v1  ;;  %vm4097_vm3 = vcmp.gt.f32.partialorder %v4061_v8, 0.0  ;;  %v4140_v42 = vmul.f32 %v6992_v25, %v4061_v8  ;;  %v4064_v60 = vadd.f32 %v6984_v21, %v4021_v13 }
 0x1e1   : > { %4213 = vst [vmem:[%s7001_s22 + $0x8] sm:$0xff] %v4177_v26  ;;  %v4020_v51 = vadd.f32 %v3849_v36, %v3590_v56  ;;  %v3593_v57 = vadd.f32 %v5464_v15, %v6884_v33  ;;  %v3429_v14 = vpop.f32.mrf.mxu1  ;;  %v3859_v52 = vpop.f32.mrf.mxu0 }
 0x1e2   : > { %v4176_v24 = vsel %vm4097_vm3, %v4061_v8, %v4140_v42  ;;  %vm4100_vm4 = vcmp.gt.f32.partialorder %v4064_v60, 0.0  ;;  %v4143_v62 = vmul.f32 %v6992_v25, %v4064_v60  ;;  %v3592_v12 = vadd.f32 %v3429_v14, %v6887_v37 }
 0x1e3   : > { %4212 = vst [vmem:[%s7001_s22] sm:$0xff] %v4176_v24  ;;  %v4063_v38 = vadd.f32 %v6984_v21, %v4020_v51  ;;  %v4023_v19 = vadd.f32 %v5520_v41, %v3593_v57  ;;  %v5467_v28 = vpop.f32.mrf.mxu1  ;;  %v5523_v53 = vpop.f32.mrf.mxu0 }
 0x1e4   : > { %v4179_v7 = vsel %vm4100_vm4, %v4064_v60, %v4143_v62  ;;  %v4022_v0 = vadd.f32 %v3859_v52, %v3592_v12  ;;  %v3595_v50 = vadd.f32 %v5467_v28, %v6890_v47 }
 0x1e5   : > { %4215 = vst [vmem:[%s7001_s22 + $0x18] sm:$0xff] %v4179_v7  ;;  %vm4099_vm5 = vcmp.gt.f32.partialorder %v4063_v38, 0.0  ;;  %v4142_v33 = vmul.f32 %v6992_v25, %v4063_v38  ;;  %v4066_v46 = vadd.f32 %v6984_v21, %v4023_v19  ;;  %v3439_v20 = vpop.f32.mrf.mxu1  ;;  %v3869_v43 = vpop.f32.mrf.mxu0 }
 0x1e6   : > { %v4065_v37 = vadd.f32 %v6984_v21, %v4022_v0  ;;  %v4025_v55 = vadd.f32 %v5523_v53, %v3595_v50  ;;  %v3594_v32 = vadd.f32 %v3439_v20, %v6893_v2 }
 0x1e7   : > { %v4178_v44 = vsel %vm4099_vm5, %v4063_v38, %v4142_v33  ;;  %vm4102_vm6 = vcmp.gt.f32.partialorder %v4066_v46, 0.0  ;;  %v4145_v36 = vmul.f32 %v6992_v25, %v4066_v46  ;;  %v5470_v1 = vpop.f32.mrf.mxu1  ;;  %v5526_v47 = vpop.f32.mrf.mxu0 }
 0x1e8   : > { %4214 = vst [vmem:[%s7001_s22 + $0x10] sm:$0xff] %v4178_v44  ;;  %vm4101_vm7 = vcmp.gt.f32.partialorder %v4065_v37, 0.0  ;;  %v4144_v8 = vmul.f32 %v6992_v25, %v4065_v37  ;;  %v4068_v13 = vadd.f32 %v6984_v21, %v4025_v55  ;;  %v4024_v56 = vadd.f32 %v3869_v43, %v3594_v32 }
 0x1e9   : > { %v4181_v15 = vsel %vm4102_vm6, %v4066_v46, %v4145_v36  ;;  %v3597_v41 = vadd.f32 %v5470_v1, %v6896_v4  ;;  %v3449_v26 = vpop.f32.mrf.mxu1  ;;  %v3879_v2 = vpop.f32.mrf.mxu0 }
 0x1ea   : > { %4217 = vst [vmem:[%s7001_s22 + $0x28] sm:$0xff] %v4181_v15  ;;  %v4180_v42 = vsel %vm4101_vm7, %v4065_v37, %v4144_v8  ;;  %vm4104_vm8 = vcmp.gt.f32.partialorder %v4068_v13, 0.0  ;;  %v4147_v60 = vmul.f32 %v6992_v25, %v4068_v13  ;;  %v4067_v51 = vadd.f32 %v6984_v21, %v4024_v56 }
 0x1eb   : > { %4216 = vst [vmem:[%s7001_s22 + $0x20] sm:$0xff] %v4180_v42  ;;  %v4027_v57 = vadd.f32 %v5526_v47, %v3597_v41  ;;  %v3596_v14 = vadd.f32 %v3449_v26, %v6899_v29  ;;  %v5473_v52 = vpop.f32.mrf.mxu1  ;;  %v5529_v24 = vpop.f32.mrf.mxu0 }
 0x1ec   : > { %v4183_v62 = vsel %vm4104_vm8, %v4068_v13, %v4147_v60  ;;  %vm4103_vm9 = vcmp.gt.f32.partialorder %v4067_v51, 0.0  ;;  %v4146_v4 = vmul.f32 %v6992_v25, %v4067_v51  ;;  %v3599_v12 = vadd.f32 %v5473_v52, %v6902_v10 }
 0x1ed   : > { %4219 = vst [vmem:[%s7001_s22 + $0x38] sm:$0xff] %v4183_v62  ;;  %v4070_v38 = vadd.f32 %v6984_v21, %v4027_v57  ;;  %v4026_v19 = vadd.f32 %v3879_v2, %v3596_v14  ;;  %v3459_v28 = vpop.f32.mrf.mxu1  ;;  %v3889_v53 = vpop.f32.mrf.mxu0 }
 0x1ee   : > { %v4182_v7 = vsel %vm4103_vm9, %v4067_v51, %v4146_v4  ;;  %v4029_v0 = vadd.f32 %v5529_v24, %v3599_v12  ;;  %v3598_v50 = vadd.f32 %v3459_v28, %v6905_v48 }
 0x1ef   : > { %4218 = vst [vmem:[%s7001_s22 + $0x30] sm:$0xff] %v4182_v7  ;;  %vm4106_vm10 = vcmp.gt.f32.partialorder %v4070_v38, 0.0  ;;  %v4149_v29 = vmul.f32 %v6992_v25, %v4070_v38  ;;  %v4069_v33 = vadd.f32 %v6984_v21, %v4026_v19  ;;  %v5476_v46 = vpop.f32.mrf.mxu1  ;;  %v5532_v20 = vpop.f32.mrf.mxu0 }
 0x1f0   : > { %v4072_v10 = vadd.f32 %v6984_v21, %v4029_v0  ;;  %v4028_v43 = vadd.f32 %v3889_v53, %v3598_v50  ;;  %v3601_v37 = vadd.f32 %v5476_v46, %v6908_v16 }
 0x1f1   : > { %v4185_v55 = vsel %vm4106_vm10, %v4070_v38, %v4149_v29  ;;  %vm4105_vm11 = vcmp.gt.f32.partialorder %v4069_v33, 0.0  ;;  %v4148_v32 = vmul.f32 %v6992_v25, %v4069_v33  ;;  %v3469_v44 = vpop.f32.mrf.mxu1  ;;  %v3899_v48 = vpop.f32.mrf.mxu0 }
 0x1f2   : > { %4221 = vst [vmem:[%s7001_s22 + $0x48] sm:$0xff] %v4185_v55  ;;  %vm4108_vm12 = vcmp.gt.f32.partialorder %v4072_v10, 0.0  ;;  %v4151_v36 = vmul.f32 %v6992_v25, %v4072_v10  ;;  %v4071_v1 = vadd.f32 %v6984_v21, %v4028_v43  ;;  %v4031_v47 = vadd.f32 %v5532_v20, %v3601_v37 }
 0x1f3   : > { %v4184_v8 = vsel %vm4105_vm11, %v4069_v33, %v4148_v32  ;;  %v3600_v13 = vadd.f32 %v3469_v44, %v6911_v9  ;;  %v5479_v56 = vpop.f32.mrf.mxu1  ;;  %v5535_v16 = vpop.f32.mrf.mxu0 }
 0x1f4   : > { %4220 = vst [vmem:[%s7001_s22 + $0x40] sm:$0xff] %v4184_v8  ;;  %v4187_v15 = vsel %vm4108_vm12, %v4072_v10, %v4151_v36  ;;  %vm4107_vm13 = vcmp.gt.f32.partialorder %v4071_v1, 0.0  ;;  %v4150_v41 = vmul.f32 %v6992_v25, %v4071_v1  ;;  %v4074_v26 = vadd.f32 %v6984_v21, %v4031_v47 }
 0x1f5   : > { %4223 = vst [vmem:[%s7001_s22 + $0x58] sm:$0xff] %v4187_v15  ;;  %v4030_v2 = vadd.f32 %v3899_v48, %v3600_v13  ;;  %v3603_v42 = vadd.f32 %v5479_v56, %v6914_v22  ;;  %v3479_v60 = vpop.f32.mrf.mxu1  ;;  %v3909_v51 = vpop.f32.mrf.mxu0 }
 0x1f6   : > { %v4186_v57 = vsel %vm4107_vm13, %v4071_v1, %v4150_v41  ;;  %vm4110_vm14 = vcmp.gt.f32.partialorder %v4074_v26, 0.0  ;;  %v4153_v9 = vmul.f32 %v6992_v25, %v4074_v26  ;;  %v3602_v14 = vadd.f32 %v3479_v60, %v6917_v63 }
 0x1f7   : > { %4222 = vst [vmem:[%s7001_s22 + $0x50] sm:$0xff] %v4186_v57  ;;  %v4073_v52 = vadd.f32 %v6984_v21, %v4030_v2  ;;  %v4033_v24 = vadd.f32 %v5535_v16, %v3603_v42  ;;  %v5482_v62 = vpop.f32.mrf.mxu1  ;;  %v5538_v4 = vpop.f32.mrf.mxu0 }
 0x1f8   : > { %v4189_v12 = vsel %vm4110_vm14, %v4074_v26, %v4153_v9  ;;  %v4032_v38 = vadd.f32 %v3909_v51, %v3602_v14  ;;  %v3605_v19 = vadd.f32 %v5482_v62, %v6920_v39 }
 0x1f9   : > { %4225 = vst [vmem:[%s7001_s22 + $0x68] sm:$0xff] %v4189_v12  ;;  %vm4109_vm15 = vcmp.gt.f32.partialorder %v4073_v52, 0.0  ;;  %v4152_v22 = vmul.f32 %v6992_v25, %v4073_v52  ;;  %v4076_v28 = vadd.f32 %v6984_v21, %v4033_v24  ;;  %v3489_v53 = vpop.f32.mrf.mxu1  ;;  %v3919_v7 = vpop.f32.mrf.mxu0 }
 0x1fa   : > { %v4075_v63 = vadd.f32 %v6984_v21, %v4032_v38  ;;  %v4035_v0 = vadd.f32 %v5538_v4, %v3605_v19  ;;  %v3604_v50 = vadd.f32 %v3489_v53, %v6923_v61 }
 0x1fb   : > { %v4188_v29 = vsel %vm4109_vm15, %v4073_v52, %v4152_v22  ;;  %vm4112_vm0 = vcmp.gt.f32.partialorder %v4076_v28, 0.0  ;;  %v4155_v33 = vmul.f32 %v6992_v25, %v4076_v28  ;;  %v5485_v46 = vpop.f32.mrf.mxu1  ;;  %v5541_v39 = vpop.f32.mrf.mxu0 }
 0x1fc   : > { %4224 = vst [vmem:[%s7001_s22 + $0x60] sm:$0xff] %v4188_v29  ;;  %vm4111_vm1 = vcmp.gt.f32.partialorder %v4075_v63, 0.0  ;;  %v4154_v20 = vmul.f32 %v6992_v25, %v4075_v63  ;;  %v4078_v10 = vadd.f32 %v6984_v21, %v4035_v0  ;;  %v4034_v43 = vadd.f32 %v3919_v7, %v3604_v50 }
 0x1fd   : > { %v4191_v37 = vsel %vm4112_vm0, %v4076_v28, %v4155_v33  ;;  %v3607_v55 = vadd.f32 %v5485_v46, %v6926_v45  ;;  %v3499_v32 = vpop.f32.mrf.mxu1  ;;  %v3929_v61 = vpop.f32.mrf.mxu0 }
 0x1fe   : > { %4227 = vst [vmem:[%s7001_s22 + $0x78] sm:$0xff] %v4191_v37  ;;  %v4190_v44 = vsel %vm4111_vm1, %v4075_v63, %v4154_v20  ;;  %vm4114_vm2 = vcmp.gt.f32.partialorder %v4078_v10, 0.0  ;;  %v4157_v48 = vmul.f32 %v6992_v25, %v4078_v10  ;;  %v4077_v36 = vadd.f32 %v6984_v21, %v4034_v43 }
 0x1ff   : > { %4226 = vst [vmem:[%s7001_s22 + $0x70] sm:$0xff] %v4190_v44  ;;  %v4037_v1 = vadd.f32 %v5541_v39, %v3607_v55  ;;  %v3606_v47 = vadd.f32 %v3499_v32, %v6929_v18  ;;  %v5488_v8 = vpop.f32.mrf.mxu1  ;;  %v5544_v13 = vpop.f32.mrf.mxu0 }
 0x200   : > { %v4193_v56 = vsel %vm4114_vm2, %v4078_v10, %v4157_v48  ;;  %vm4113_vm3 = vcmp.gt.f32.partialorder %v4077_v36, 0.0  ;;  %v4156_v45 = vmul.f32 %v6992_v25, %v4077_v36  ;;  %v3609_v16 = vadd.f32 %v5488_v8, %v6932_v59 }
 0x201   : > { %4229 = vst [vmem:[%s7001_s22 + $0x88] sm:$0xff] %v4193_v56  ;;  %v4080_v15 = vadd.f32 %v6984_v21, %v4037_v1  ;;  %v4036_v41 = vadd.f32 %v3929_v61, %v3606_v47  ;;  %v3509_v26 = vpop.f32.mrf.mxu1  ;;  %v3939_v2 = vpop.f32.mrf.mxu0 }
 0x202   : > { %v4192_v42 = vsel %vm4113_vm3, %v4077_v36, %v4156_v45  ;;  %v4039_v60 = vadd.f32 %v5544_v13, %v3609_v16  ;;  %v3608_v51 = vadd.f32 %v3509_v26, %v6935_v34 }
 0x203   : > { %4228 = vst [vmem:[%s7001_s22 + $0x80] sm:$0xff] %v4192_v42  ;;  %vm4116_vm4 = vcmp.gt.f32.partialorder %v4080_v15, 0.0  ;;  %v4159_v18 = vmul.f32 %v6992_v25, %v4080_v15  ;;  %v4079_v57 = vadd.f32 %v6984_v21, %v4036_v41  ;;  %v5491_v9 = vpop.f32.mrf.mxu1  ;;  %v5547_v14 = vpop.f32.mrf.mxu0 }
 0x204   : > { %v4082_v59 = vadd.f32 %v6984_v21, %v4039_v60  ;;  %v4038_v52 = vadd.f32 %v3939_v2, %v3608_v51  ;;  %v3611_v24 = vadd.f32 %v5491_v9, %v6938_v3 }
 0x205   : > { %v4195_v62 = vsel %vm4116_vm4, %v4080_v15, %v4159_v18  ;;  %vm4115_vm5 = vcmp.gt.f32.partialorder %v4079_v57, 0.0  ;;  %v4158_v4 = vmul.f32 %v6992_v25, %v4079_v57  ;;  %v3519_v12 = vpop.f32.mrf.mxu1  ;;  %v3949_v34 = vpop.f32.mrf.mxu0 }
 0x206   : > { %4231 = vst [vmem:[%s7001_s22 + $0x98] sm:$0xff] %v4195_v62  ;;  %vm4118_vm6 = vcmp.gt.f32.partialorder %v4082_v59, 0.0  ;;  %v4161_v38 = vmul.f32 %v6992_v25, %v4082_v59  ;;  %v4081_v19 = vadd.f32 %v6984_v21, %v4038_v52  ;;  %v4041_v22 = vadd.f32 %v5547_v14, %v3611_v24 }
 0x207   : > { %v4194_v28 = vsel %vm4115_vm5, %v4079_v57, %v4158_v4  ;;  %v3610_v53 = vadd.f32 %v3519_v12, %v6941_v54  ;;  %v5494_v7 = vpop.f32.mrf.mxu1  ;;  %v5550_v3 = vpop.f32.mrf.mxu0 }
 0x208   : > { %4230 = vst [vmem:[%s7001_s22 + $0x90] sm:$0xff] %v4194_v28  ;;  %v4197_v63 = vsel %vm4118_vm6, %v4082_v59, %v4161_v38  ;;  %vm4117_vm7 = vcmp.gt.f32.partialorder %v4081_v19, 0.0  ;;  %v4160_v0 = vmul.f32 %v6992_v25, %v4081_v19  ;;  %v4084_v50 = vadd.f32 %v6984_v21, %v4041_v22 }
 0x209   : > { %4233 = vst [vmem:[%s7001_s22 + $0xa8] sm:$0xff] %v4197_v63  ;;  %v4040_v29 = vadd.f32 %v3949_v34, %v3610_v53  ;;  %v3613_v33 = vadd.f32 %v5494_v7, %v6944_v58  ;;  %v3529_v46 = vpop.f32.mrf.mxu1  ;;  %v3959_v39 = vpop.f32.mrf.mxu0 }
 0x20a   : > { %v4196_v20 = vsel %vm4117_vm7, %v4081_v19, %v4160_v0  ;;  %vm4120_vm8 = vcmp.gt.f32.partialorder %v4084_v50, 0.0  ;;  %v4163_v54 = vmul.f32 %v6992_v25, %v4084_v50  ;;  %v3612_v10 = vadd.f32 %v3529_v46, %v6947_v27 }
 0x20b   : > { %4232 = vst [vmem:[%s7001_s22 + $0xa0] sm:$0xff] %v4196_v20  ;;  %v4083_v43 = vadd.f32 %v6984_v21, %v4040_v29  ;;  %v4043_v37 = vadd.f32 %v5550_v3, %v3613_v33  ;;  %v5497_v55 = vpop.f32.mrf.mxu1  ;;  %v5553_v32 = vpop.f32.mrf.mxu0 }
 0x20c   : > { %v4199_v61 = vsel %vm4120_vm8, %v4084_v50, %v4163_v54  ;;  %v4042_v44 = vadd.f32 %v3959_v39, %v3612_v10  ;;  %v3615_v48 = vadd.f32 %v5497_v55, %v6950_v5 }
 0x20d   : > { %4235 = vst [vmem:[%s7001_s22 + $0xb8] sm:$0xff] %v4199_v61  ;;  %vm4119_vm9 = vcmp.gt.f32.partialorder %v4083_v43, 0.0  ;;  %v4162_v58 = vmul.f32 %v6992_v25, %v4083_v43  ;;  %v4086_v36 = vadd.f32 %v6984_v21, %v4043_v37  ;;  %v3539_v1 = vpop.f32.mrf.mxu1  ;;  %v3969_v47 = vpop.f32.mrf.mxu0 }
 0x20e   : > { %v4085_v27 = vadd.f32 %v6984_v21, %v4042_v44  ;;  %v4045_v8 = vadd.f32 %v5553_v32, %v3615_v48  ;;  %v3614_v13 = vadd.f32 %v3539_v1, %v6953_v40 }
 0x20f   : > { %v4198_v56 = vsel %vm4119_vm9, %v4083_v43, %v4162_v58  ;;  %vm4122_vm10 = vcmp.gt.f32.partialorder %v4086_v36, 0.0  ;;  %v4165_v45 = vmul.f32 %v6992_v25, %v4086_v36  ;;  %v5500_v16 = vpop.f32.mrf.mxu1  ;;  %v5556_v5 = vpop.f32.mrf.mxu0 }
 0x210   : > { %4234 = vst [vmem:[%s7001_s22 + $0xb0] sm:$0xff] %v4198_v56  ;;  %vm4121_vm11 = vcmp.gt.f32.partialorder %v4085_v27, 0.0  ;;  %v4164_v15 = vmul.f32 %v6992_v25, %v4085_v27  ;;  %v4088_v41 = vadd.f32 %v6984_v21, %v4045_v8  ;;  %v4044_v26 = vadd.f32 %v3969_v47, %v3614_v13 }
 0x211   : > { %v4201_v2 = vsel %vm4122_vm10, %v4086_v36, %v4165_v45  ;;  %v3617_v42 = vadd.f32 %v5500_v16, %v6956_v11  ;;  %v3549_v60 = vpop.f32.mrf.mxu1  ;;  %v3979_v40 = vpop.f32.mrf.mxu0 }
 0x212   : > { %4237 = vst [vmem:[%s7001_s22 + $0xc8] sm:$0xff] %v4201_v2  ;;  %v4200_v51 = vsel %vm4121_vm11, %v4085_v27, %v4164_v15  ;;  %vm4124_vm12 = vcmp.gt.f32.partialorder %v4088_v41, 0.0  ;;  %v4167_v18 = vmul.f32 %v6992_v25, %v4088_v41  ;;  %v4087_v57 = vadd.f32 %v6984_v21, %v4044_v26 }
 0x213   : > { %4236 = vst [vmem:[%s7001_s22 + $0xc0] sm:$0xff] %v4200_v51  ;;  %v4047_v9 = vadd.f32 %v5556_v5, %v3617_v42  ;;  %v3616_v14 = vadd.f32 %v3549_v60, %v6959_v6  ;;  %v5503_v59 = vpop.f32.mrf.mxu1  ;;  %v5559_v52 = vpop.f32.mrf.mxu0 }
 0x214   : > { %v4203_v24 = vsel %vm4124_vm12, %v4088_v41, %v4167_v18  ;;  %vm4123_vm13 = vcmp.gt.f32.partialorder %v4087_v57, 0.0  ;;  %v4166_v11 = vmul.f32 %v6992_v25, %v4087_v57  ;;  %v3619_v62 = vadd.f32 %v5503_v59, %v6962_v17 }
 0x215   : > { %4239 = vst [vmem:[%s7001_s22 + $0xd8] sm:$0xff] %v4203_v24  ;;  %v4090_v4 = vadd.f32 %v6984_v21, %v4047_v9  ;;  %v4046_v12 = vadd.f32 %v3979_v40, %v3616_v14  ;;  %v3559_v34 = vpop.f32.mrf.mxu1  ;;  %v3989_v38 = vpop.f32.mrf.mxu0 }
 0x216   : > { %v4202_v19 = vsel %vm4123_vm13, %v4087_v57, %v4166_v11  ;;  %v4049_v22 = vadd.f32 %v5559_v52, %v3619_v62  ;;  %v3618_v28 = vadd.f32 %v3559_v34, %v6965_v30 }
 0x217   : > { %4238 = vst [vmem:[%s7001_s22 + $0xd0] sm:$0xff] %v4202_v19  ;;  %vm4126_vm14 = vcmp.gt.f32.partialorder %v4090_v4, 0.0  ;;  %v4169_v6 = vmul.f32 %v6992_v25, %v4090_v4  ;;  %v4089_v53 = vadd.f32 %v6984_v21, %v4046_v12  ;;  %v5506_v7 = vpop.f32.mrf.mxu1  ;;  %v5562_v3 = vpop.f32.mrf.mxu0 }
 0x218   : > { %v4092_v17 = vadd.f32 %v6984_v21, %v4049_v22  ;;  %v4048_v63 = vadd.f32 %v3989_v38, %v3618_v28  ;;  %v3621_v0 = vadd.f32 %v5506_v7, %v6968_v23 }
 0x219   : > { %v4205_v50 = vsel %vm4126_vm14, %v4090_v4, %v4169_v6  ;;  %vm4125_vm15 = vcmp.gt.f32.partialorder %v4089_v53, 0.0  ;;  %v4168_v29 = vmul.f32 %v6992_v25, %v4089_v53  ;;  %v3569_v33 = vpop.f32.mrf.mxu1  ;;  %v3999_v30 = vpop.f32.mrf.mxu0 }
 0x21a   : > { %4241 = vst [vmem:[%s7001_s22 + $0xe8] sm:$0xff] %v4205_v50  ;;  %vm4128_vm0 = vcmp.gt.f32.partialorder %v4092_v17, 0.0  ;;  %v4171_v46 = vmul.f32 %v6992_v25, %v4092_v17  ;;  %v4091_v39 = vadd.f32 %v6984_v21, %v4048_v63  ;;  %v4051_v20 = vadd.f32 %v5562_v3, %v3621_v0 }
 0x21b   : > { %v4204_v54 = vsel %vm4125_vm15, %v4089_v53, %v4168_v29  ;;  %v3620_v10 = vadd.f32 %v3569_v33, %v6971_v49  ;;  %v5509_v43 = vpop.f32.mrf.mxu1  ;;  %v5565_v23 = vpop.f32.mrf.mxu0 }
 0x21c   : > { %4240 = vst [vmem:[%s7001_s22 + $0xe0] sm:$0xff] %v4204_v54  ;;  %v4207_v37 = vsel %vm4128_vm0, %v4092_v17, %v4171_v46  ;;  %vm4127_vm1 = vcmp.gt.f32.partialorder %v4091_v39, 0.0  ;;  %v4170_v55 = vmul.f32 %v6992_v25, %v4091_v39  ;;  %v4094_v32 = vadd.f32 %v6984_v21, %v4051_v20 }
 0x21d   : > { %4243 = vst [vmem:[%s7001_s22 + $0xf8] sm:$0xff] %v4207_v37  ;;  %v4050_v61 = vadd.f32 %v3999_v30, %v3620_v10  ;;  %v3623_v44 = vadd.f32 %v5509_v43, %v6974_v35  ;;  %v3579_v48 = vpop.f32.mrf.mxu1  ;;  %v4009_v27 = vpop.f32.mrf.mxu0 }
 0x21e   : > { %v4206_v58 = vsel %vm4127_vm1, %v4091_v39, %v4170_v55  ;;  %vm4130_vm2 = vcmp.gt.f32.partialorder %v4094_v32, 0.0  ;;  %v4173_v49 = vmul.f32 %v6992_v25, %v4094_v32  ;;  %v3622_v36 = vadd.f32 %v3579_v48, %v6978_v31 }
 0x21f   : > { %4242 = vst [vmem:[%s7001_s22 + $0xf0] sm:$0xff] %v4206_v58  ;;  %v4093_v1 = vadd.f32 %v6984_v21, %v4050_v61  ;;  %v4053_v47 = vadd.f32 %v5565_v23, %v3623_v44 }
 0x220   : > { %v4209_v8 = vsel %vm4130_vm2, %v4094_v32, %v4173_v49  ;;  %v4052_v13 = vadd.f32 %v4009_v27, %v3622_v36 }
 0x221   : > { %4245 = vst [vmem:[%s7001_s22 + $0x108] sm:$0xff] %v4209_v8  ;;  %vm4129_vm3 = vcmp.gt.f32.partialorder %v4093_v1, 0.0  ;;  %v4172_v35 = vmul.f32 %v6992_v25, %v4093_v1  ;;  %v4096_v56 = vadd.f32 %v6984_v21, %v4053_v47 }
 0x222   : > { %v4095_v31 = vadd.f32 %v6984_v21, %v4052_v13 }
 0x223   : > { %v4208_v45 = vsel %vm4129_vm3, %v4093_v1, %v4172_v35  ;;  %vm4132_vm4 = vcmp.gt.f32.partialorder %v4096_v56, 0.0  ;;  %v4175_v16 = vmul.f32 %v6992_v25, %v4096_v56 }
 0x224   : > { %4244 = vst [vmem:[%s7001_s22 + $0x100] sm:$0xff] %v4208_v45  ;;  %vm4131_vm5 = vcmp.gt.f32.partialorder %v4095_v31, 0.0  ;;  %v4174_v5 = vmul.f32 %v6992_v25, %v4095_v31 }
 0x225   : > { %v4211_v21 = vsel %vm4132_vm4, %v4096_v56, %v4175_v16 }
 0x226   : > { %4247 = vst [vmem:[%s7001_s22 + $0x118] sm:$0xff] %v4211_v21  ;;  %v4210_v15 = vsel %vm4131_vm5, %v4095_v31, %v4174_v5 }
 0x227   : > { %4246 = vst [vmem:[%s7001_s22 + $0x110] sm:$0xff] %v4210_v15 }
 0x228   : > { %5641 = shalt.err (!%p5638_p5)
}
 0x229   : > { %s5642_s10 = scalar_lea.hbm %s7141_s30, 4608  ;;  %s5646_s13 = scalar_lea.hbm %s7198_s4, 9216 }
 0x22a   : > { %p5643_p6 = scmp.ne.s32.totalorder %s7141_s30, %s5642_s10  ;;  %p5647_p10 = scmp.lt.s32.totalorder %s7141_s30, %s7198_s4 }
 0x22b   : > { %p5648_p11 = scmp.lt.s32.totalorder %s5646_s13, %s5642_s10 }
 0x22c   : > { %p5644_p7 = pnand %p5643_p6, %p5774_p4 }
 0x22d   : > { %p5649_p12 = por %p5648_p11, %p5647_p10 }
 0x22e   : > { %p5645_p9 = pneg %p5644_p7 }
 0x230   : > { %p5650_p13 = pnand %p5649_p12, %p5645_p9 }
 0x232   : > { %5653 = shalt.err (!%p5650_p13)
}
 0x233   : > { %s5707_s22 = smov 128   ;;  %s5708_s24 = smov 8  }
 0x234   : > { %5571 = dma.vmem_to_hbm [thread:$0]  (%p5774_p4), %s7143_s26, 4608, %s7141_s30, %s7149_s5, %s5707_s22, %s5707_s22, %s5708_s24  }
 0x235 PF: > { %p5577_p0 = scmp.ge.s32.totalorder %s5704_s20, 2  ;;  %s4278_s18 = sand.u32 1, %s5684_s15  }
 0x236   : > { %s4279_s29 = scalar_lea.sflag [#allocation3], %s4278_s18 }
 0x237   : > { %p5574_p1 = pnand %p5577_p0, %p5781_p8 }
 0x239   : > { %p5575_p2 = pneg %p5574_p1 }
 0x23b   : > { %5679 = dma.done.wait (%p5575_p2), %s4279_s29, 4608  }
 0x23c   : > { %5681 = vsyncadd (%p5575_p2), %s4279_s29, 4294962688  ;;  %s17_s20 = sadd.s32 1, %s5704_s20   ;;  %s7201_s15 = smov %s5688_s16 }
 0x23d   : > { %p14_p3 = scmp.ge.s32.totalorder %s17_s20, 4   ;;  %s7202_s16 = smov %s5692_s17 }
 0x23e   : > { %s7203_s17 = smov %s5787_s28  ;;  %s7204_s18 = smov %s5700_s19 }
 0x23f   : > { %s7205_s19 = smov %s7207_s23  ;;  %16 = sbr.rel (!%p14_p3) target bundleno = 4 (0x4), region = 88 }
 0x244   :  { %4284 = vsyncpa [#allocation3], 1 }
 0x245   :  { %4286 = vsyncpa [#allocation3 + $0x1], 1 }

</bundles_post_ra>
